<compile_context>
chip_gen: v7x
topology: tpu7x:2x2x1
jax: 0.10.0
libtpu: 0.0.40
codegen_flags: <defaults>
</compile_context>

<pallas_src>
import functools

import jax
import jax.numpy as jnp
from jax.experimental import pallas as pl
from jax.experimental.pallas import tpu as pltpu


_LANE = 128  # TPU lane width; all feature dims are padded to this.


def _round_up(x, m):
    return (x + m - 1) // m * m


def _pad2(a, rows, cols):
    a = jnp.asarray(a, jnp.float32)
    return jnp.pad(a, ((0, rows - a.shape[0]), (0, cols - a.shape[1])))


# ---------------------------------------------------------------------------
# Fused Pallas kernel: all conv layers + pred linear in one invocation.
# ---------------------------------------------------------------------------
def _gcn_fused_kernel(num_layers, x_ref, a_ref, wc_ref, bc_ref, wp_ref, bp_ref,
                      o_ref):
    # x_ref : (Np, 128) f32        a_ref : (Np, Np) bf16
    # wc_ref: (L, 128, 256) f32    bc_ref: (L, 1, 256) f32
    #   wc[:, :, :128]  = W1  = Wl @ Wua   (A-side, lin folded into update)
    #   wc[:, :, 128:]  = Wux              (x-side of lin_update)
    # wp_ref: (128, 128) f32       bp_ref: (1, 128) f32
    # o_ref : (Np, 128) f32
    a = a_ref[...]
    h = x_ref[...]
    for i in range(num_layers):  # static unroll; features stay VMEM/vreg-resident
        hc = jnp.dot(h, wc_ref[i], preferred_element_type=jnp.float32) + bc_ref[i]
        t = hc[:, :_LANE]    # h @ W1 + b1   (goes through A)
        xs = hc[:, _LANE:]   # h @ Wux + bu  (skip / x-side term)
        agg = jnp.dot(a, t.astype(jnp.bfloat16),
                      preferred_element_type=jnp.float32)
        h = agg + xs
        if i != num_layers - 1:
            h = jnp.maximum(h, 0.0)
    o_ref[...] = (jnp.dot(h, wp_ref[...], preferred_element_type=jnp.float32)
                  + bp_ref[...])


def _full_spec(shape):
    # Whole array as a single block (no grid).
    return pl.BlockSpec(shape, lambda: tuple(0 for _ in shape))


# ---------------------------------------------------------------------------
# One-time weight packing (hoisted out of the per-forward path).
# ---------------------------------------------------------------------------
def pack_params(params):
    """Fold wua into the lin weight, merge A-side/x-side weights into one
    (128, 256) matrix per layer, zero-pad to 128 lanes, stack per layer."""
    D = _LANE
    wc, bc = [], []
    with jax.default_matmul_precision("highest"):  # exact one-time fold
        for c in params["convs"]:
            dout, din = c["w_lin"].shape
            wl = jnp.asarray(c["w_lin"], jnp.float32).T            # (din, dout)
            wua = jnp.asarray(c["w_upd"][:, :dout], jnp.float32).T  # (dout, dout)
            wux = jnp.asarray(c["w_upd"][:, dout:], jnp.float32).T  # (din, dout)
            bl = jnp.asarray(c["b_lin"], jnp.float32).reshape(1, dout)
            bu = jnp.asarray(c["b_upd"], jnp.float32).reshape(1, dout)
            w1 = wl @ wua   # (din, dout)  -- agg @ Wua folded into the lin weight
            b1 = bl @ wua   # (1, dout)
            wc_i = (jnp.zeros((D, 2 * D), jnp.float32)
                    .at[:din, :dout].set(w1)
                    .at[:din, D:D + dout].set(wux))
            bc_i = (jnp.zeros((1, 2 * D), jnp.float32)
                    .at[0, :dout].set(b1[0])
                    .at[0, D:D + dout].set(bu[0]))
            wc.append(wc_i)
            bc.append(bc_i)
    packed = dict(
        wc=jnp.stack(wc), bc=jnp.stack(bc),
        wp=_pad2(params["pred_w"].T, D, D),
        bp=_pad2(params["pred_b"].reshape(1, -1), 1, D),
    )
    return packed, len(params["convs"])


def pad_adjacency(adj):
    """Pad dense A[target, source] to a (n_pad, n_pad) bf16 block, once,
    outside the jitted forward (edge counts are small ints -> exact in bf16)."""
    n = adj.shape[0]
    n_pad = _round_up(max(n, 1), _LANE)
    return (jnp.zeros((n_pad, n_pad), jnp.bfloat16)
            .at[:n, :n].set(jnp.asarray(adj, jnp.float32).astype(jnp.bfloat16)))


def make_gcn_forward(params, num_nodes, input_dim, label_dim):
    """Build a jitted forward: (x[N,Din], a_pad[n_pad,n_pad] bf16) -> logits[N,label_dim]."""
    packed, num_layers = pack_params(params)
    D = _LANE
    n_pad = _round_up(max(num_nodes, 1), _LANE)
    kernel = functools.partial(_gcn_fused_kernel, num_layers)

    weight_bytes = sum(int(v.size) * 4 for v in packed.values())
    cost = pl.CostEstimate(
        flops=num_layers * (2 * n_pad * D * (2 * D) + 2 * n_pad * n_pad * D)
              + 2 * n_pad * D * D,
        transcendentals=0,
        bytes_accessed=n_pad * n_pad * 2 + 2 * n_pad * D * 4 + weight_bytes,
    )

    @jax.jit
    def forward(x, a_pad):
        x_pad = jnp.zeros((n_pad, D), jnp.float32).at[:num_nodes, :input_dim].set(x)
        out = pl.pallas_call(
            kernel,
            out_shape=jax.ShapeDtypeStruct((n_pad, D), jnp.float32),
            in_specs=[_full_spec((n_pad, D)), _full_spec((n_pad, n_pad)),
                      _full_spec(packed["wc"].shape), _full_spec(packed["bc"].shape),
                      _full_spec(packed["wp"].shape), _full_spec(packed["bp"].shape)],
            out_specs=_full_spec((n_pad, D)),
            compiler_params=pltpu.CompilerParams(
                vmem_limit_bytes=64 * 1024 * 1024),
            cost_estimate=cost,
        )(x_pad, a_pad, packed["wc"], packed["bc"], packed["wp"], packed["bp"])
        return out[:num_nodes, :label_dim]

    return forward


# ---------------------------------------------------------------------------
# Pure-JAX reference (unfused, torch-layout) for validation.
# ---------------------------------------------------------------------------
def gcn_reference(x, adj, params):
    num_layers = len(params["convs"])
    h = x
    with jax.default_matmul_precision("highest"):
        for i, c in enumerate(params["convs"]):
            msg = h @ c["w_lin"].T + c["b_lin"]
            agg = adj @ msg
            out = jnp.concatenate([agg, h], axis=1) @ c["w_upd"].T + c["b_upd"]
            if i != num_layers - 1:
                out = jnp.maximum(out, 0.0)
            h = out
        return h @ params["pred_w"].T + params["pred_b"]


# ---------------------------------------------------------------------------
# Parameter / input construction
# ---------------------------------------------------------------------------
def init_params(key, input_dim, hidden_dim, embedding_dim, label_dim, num_layers):
    dims = [input_dim] + [hidden_dim] * (num_layers - 1) + [embedding_dim]
    convs = []
    for i in range(num_layers):
        din, dout = dims[i], dims[i + 1]
        key, k1, k2, k3, k4 = jax.random.split(key, 5)
        convs.append(dict(
            w_lin=jax.random.normal(k1, (dout, din), jnp.float32) * 0.1,
            b_lin=jax.random.normal(k2, (dout,), jnp.float32) * 0.1,
            w_upd=jax.random.normal(k3, (dout, dout + din), jnp.float32) * 0.1,
            b_upd=jax.random.normal(k4, (dout,), jnp.float32) * 0.1,
        ))
    key, k1, k2 = jax.random.split(key, 3)
    return dict(
        convs=convs,
        pred_w=jax.random.normal(k1, (label_dim, embedding_dim), jnp.float32) * 0.1,
        pred_b=jax.random.normal(k2, (label_dim,), jnp.float32) * 0.1,
    )


def build_dense_adjacency(edge_index, num_nodes):
    """A[target, source] = #edges source->target, self-loops removed."""
    src, tgt = edge_index[0], edge_index[1]
    keep = (src != tgt).astype(jnp.float32)
    adj = jnp.zeros((num_nodes, num_nodes), jnp.float32)
    adj = adj.at[tgt, src].add(keep)
    return adj


# ---------------------------------------------------------------------------
if __name__ == "__main__":
    key = jax.random.PRNGKey(0)

    num_nodes = 16
    input_dim, hidden_dim, embedding_dim, label_dim = 8, 32, 32, 4
    num_layers = 3
    num_edges = 48

    key, kx, ke1, ke2, kp = jax.random.split(key, 5)
    x = jax.random.normal(kx, (num_nodes, input_dim), jnp.float32)
    edge_index = jnp.stack([
        jax.random.randint(ke1, (num_edges,), 0, num_nodes),
        jax.random.randint(ke2, (num_edges,), 0, num_nodes),
    ], axis=0)
    adj = build_dense_adjacency(edge_index, num_nodes)
    a_pad = pad_adjacency(adj)  # padded + bf16-cast once, outside the jit

    params = init_params(kp, input_dim, hidden_dim, embedding_dim,
                         label_dim, num_layers)

    forward = make_gcn_forward(params, num_nodes, input_dim, label_dim)
    out = forward(x, a_pad)
    jax.block_until_ready(out)

    assert out.shape == (num_nodes, label_dim)
    ref = gcn_reference(x, adj, params)
    assert bool(jnp.allclose(out, ref, rtol=1e-2, atol=1e-2)), "kernel/reference mismatch"
    print("KERNEL_OK")
</pallas_src>

<mosaic_0001>
module attributes {stable_mosaic.version = 11 : i64} {
  func.func @_gcn_fused_kernel(%arg0: memref<128x128xf32, #tpu.memory_space<vmem>>, %arg1: memref<128x128xbf16, #tpu.memory_space<vmem>>, %arg2: memref<3x128x256xf32, #tpu.memory_space<vmem>>, %arg3: memref<3x1x256xf32, #tpu.memory_space<vmem>>, %arg4: memref<128x128xf32, #tpu.memory_space<vmem>>, %arg5: memref<1x128xf32, #tpu.memory_space<vmem>>, %arg6: memref<128x128xf32, #tpu.memory_space<vmem>>) attributes {dimension_semantics = [], scalar_prefetch = 0 : i64, scratch_operands = 0 : i64, tpu.core_type = #tpu.core_type<tc>} {
    %c0 = arith.constant 0 : index
    %c0_0 = arith.constant 0 : index
    %0 = vector.load %arg1[%c0, %c0_0] : memref<128x128xbf16, #tpu.memory_space<vmem>>, vector<128x128xbf16>
    %c0_1 = arith.constant 0 : index
    %c0_2 = arith.constant 0 : index
    %1 = vector.load %arg0[%c0_1, %c0_2] : memref<128x128xf32, #tpu.memory_space<vmem>>, vector<128x128xf32>
    %c0_3 = arith.constant 0 : index
    %c0_4 = arith.constant 0 : index
    %c0_5 = arith.constant 0 : index
    %2 = vector.load %arg2[%c0_3, %c0_4, %c0_5] : memref<3x128x256xf32, #tpu.memory_space<vmem>>, vector<1x128x256xf32>
    %3 = vector.shape_cast %2 : vector<1x128x256xf32> to vector<128x256xf32>
    %cst = arith.constant dense<0.000000e+00> : vector<128x256xf32>
    %4 = tpu.matmul %1, %3, %cst {dimension_numbers = #tpu.dot_dimension_numbers<[1], [0], [0], [1], [0, 0, 1, 1], [], []>} : vector<128x128xf32>, vector<128x256xf32>, vector<128x256xf32> -> vector<128x256xf32>
    %c0_6 = arith.constant 0 : index
    %c0_7 = arith.constant 0 : index
    %c0_8 = arith.constant 0 : index
    %5 = vector.load %arg3[%c0_6, %c0_7, %c0_8] : memref<3x1x256xf32, #tpu.memory_space<vmem>>, vector<1x1x256xf32>
    %6 = vector.shape_cast %5 : vector<1x1x256xf32> to vector<1x256xf32>
    %7 = vector.broadcast %6 : vector<1x256xf32> to vector<128x256xf32>
    %8 = arith.addf %4, %7 : vector<128x256xf32>
    %9 = vector.extract_strided_slice %8 {offsets = [0, 0], sizes = [128, 128], strides = [1, 1]} : vector<128x256xf32> to vector<128x128xf32>
    %10 = vector.extract_strided_slice %8 {offsets = [0, 128], sizes = [128, 128], strides = [1, 1]} : vector<128x256xf32> to vector<128x128xf32>
    %11 = arith.truncf %9 : vector<128x128xf32> to vector<128x128xbf16>
    %cst_9 = arith.constant dense<0.000000e+00> : vector<128x128xf32>
    %12 = tpu.matmul %0, %11, %cst_9 {dimension_numbers = #tpu.dot_dimension_numbers<[1], [0], [0], [1], [0, 0, 1, 1], [], []>} : vector<128x128xbf16>, vector<128x128xbf16>, vector<128x128xf32> -> vector<128x128xf32>
    %13 = arith.addf %12, %10 : vector<128x128xf32>
    %cst_10 = arith.constant 0.000000e+00 : f32
    %14 = vector.broadcast %cst_10 : f32 to vector<128x128xf32>
    %15 = arith.maximumf %13, %14 : vector<128x128xf32>
    %c1 = arith.constant 1 : index
    %c0_11 = arith.constant 0 : index
    %c0_12 = arith.constant 0 : index
    %16 = vector.load %arg2[%c1, %c0_11, %c0_12] : memref<3x128x256xf32, #tpu.memory_space<vmem>>, vector<1x128x256xf32>
    %17 = vector.shape_cast %16 : vector<1x128x256xf32> to vector<128x256xf32>
    %cst_13 = arith.constant dense<0.000000e+00> : vector<128x256xf32>
    %18 = tpu.matmul %15, %17, %cst_13 {dimension_numbers = #tpu.dot_dimension_numbers<[1], [0], [0], [1], [0, 0, 1, 1], [], []>} : vector<128x128xf32>, vector<128x256xf32>, vector<128x256xf32> -> vector<128x256xf32>
    %c1_14 = arith.constant 1 : index
    %c0_15 = arith.constant 0 : index
    %c0_16 = arith.constant 0 : index
    %19 = vector.load %arg3[%c1_14, %c0_15, %c0_16] : memref<3x1x256xf32, #tpu.memory_space<vmem>>, vector<1x1x256xf32>
    %20 = vector.shape_cast %19 : vector<1x1x256xf32> to vector<1x256xf32>
    %21 = vector.broadcast %20 : vector<1x256xf32> to vector<128x256xf32>
    %22 = arith.addf %18, %21 : vector<128x256xf32>
    %23 = vector.extract_strided_slice %22 {offsets = [0, 0], sizes = [128, 128], strides = [1, 1]} : vector<128x256xf32> to vector<128x128xf32>
    %24 = vector.extract_strided_slice %22 {offsets = [0, 128], sizes = [128, 128], strides = [1, 1]} : vector<128x256xf32> to vector<128x128xf32>
    %25 = arith.truncf %23 : vector<128x128xf32> to vector<128x128xbf16>
    %cst_17 = arith.constant dense<0.000000e+00> : vector<128x128xf32>
    %26 = tpu.matmul %0, %25, %cst_17 {dimension_numbers = #tpu.dot_dimension_numbers<[1], [0], [0], [1], [0, 0, 1, 1], [], []>} : vector<128x128xbf16>, vector<128x128xbf16>, vector<128x128xf32> -> vector<128x128xf32>
    %27 = arith.addf %26, %24 : vector<128x128xf32>
    %cst_18 = arith.constant 0.000000e+00 : f32
    %28 = vector.broadcast %cst_18 : f32 to vector<128x128xf32>
    %29 = arith.maximumf %27, %28 : vector<128x128xf32>
    %c2 = arith.constant 2 : index
    %c0_19 = arith.constant 0 : index
    %c0_20 = arith.constant 0 : index
    %30 = vector.load %arg2[%c2, %c0_19, %c0_20] : memref<3x128x256xf32, #tpu.memory_space<vmem>>, vector<1x128x256xf32>
    %31 = vector.shape_cast %30 : vector<1x128x256xf32> to vector<128x256xf32>
    %cst_21 = arith.constant dense<0.000000e+00> : vector<128x256xf32>
    %32 = tpu.matmul %29, %31, %cst_21 {dimension_numbers = #tpu.dot_dimension_numbers<[1], [0], [0], [1], [0, 0, 1, 1], [], []>} : vector<128x128xf32>, vector<128x256xf32>, vector<128x256xf32> -> vector<128x256xf32>
    %c2_22 = arith.constant 2 : index
    %c0_23 = arith.constant 0 : index
    %c0_24 = arith.constant 0 : index
    %33 = vector.load %arg3[%c2_22, %c0_23, %c0_24] : memref<3x1x256xf32, #tpu.memory_space<vmem>>, vector<1x1x256xf32>
    %34 = vector.shape_cast %33 : vector<1x1x256xf32> to vector<1x256xf32>
    %35 = vector.broadcast %34 : vector<1x256xf32> to vector<128x256xf32>
    %36 = arith.addf %32, %35 : vector<128x256xf32>
    %37 = vector.extract_strided_slice %36 {offsets = [0, 0], sizes = [128, 128], strides = [1, 1]} : vector<128x256xf32> to vector<128x128xf32>
    %38 = vector.extract_strided_slice %36 {offsets = [0, 128], sizes = [128, 128], strides = [1, 1]} : vector<128x256xf32> to vector<128x128xf32>
    %39 = arith.truncf %37 : vector<128x128xf32> to vector<128x128xbf16>
    %cst_25 = arith.constant dense<0.000000e+00> : vector<128x128xf32>
    %40 = tpu.matmul %0, %39, %cst_25 {dimension_numbers = #tpu.dot_dimension_numbers<[1], [0], [0], [1], [0, 0, 1, 1], [], []>} : vector<128x128xbf16>, vector<128x128xbf16>, vector<128x128xf32> -> vector<128x128xf32>
    %41 = arith.addf %40, %38 : vector<128x128xf32>
    %c0_26 = arith.constant 0 : index
    %c0_27 = arith.constant 0 : index
    %42 = vector.load %arg4[%c0_26, %c0_27] : memref<128x128xf32, #tpu.memory_space<vmem>>, vector<128x128xf32>
    %cst_28 = arith.constant dense<0.000000e+00> : vector<128x128xf32>
    %43 = tpu.matmul %41, %42, %cst_28 {dimension_numbers = #tpu.dot_dimension_numbers<[1], [0], [0], [1], [0, 0, 1, 1], [], []>} : vector<128x128xf32>, vector<128x128xf32>, vector<128x128xf32> -> vector<128x128xf32>
    %c0_29 = arith.constant 0 : index
    %c0_30 = arith.constant 0 : index
    %44 = vector.load %arg5[%c0_29, %c0_30] : memref<1x128xf32, #tpu.memory_space<vmem>>, vector<1x128xf32>
    %45 = vector.broadcast %44 : vector<1x128xf32> to vector<128x128xf32>
    %46 = arith.addf %43, %45 : vector<128x128xf32>
    %c0_31 = arith.constant 0 : index
    %c0_32 = arith.constant 0 : index
    %47 = vector.load %arg6[%c0_31, %c0_32] : memref<128x128xf32, #tpu.memory_space<vmem>>, vector<128x128xf32>
    tpu.vector_store %arg6[%c0_31, %c0_32], %46 {strides = array<i32>} : memref<128x128xf32, #tpu.memory_space<vmem>>, vector<128x128xf32>,
    return
  }
}

</mosaic_0001>

<bundles_post_ra>
// kernel: forward.1
= control target key start
LH: loop header
LB: loop body
LE: loop exit
PB: predicated region body
PF: predicated region fallthrough
CT: control target
= control target key end

     0   :  { %11 = vsyncpa [#allocation3], 0  ;;  %s2368_s0 = inlined_call_operand.hbm [shape: f32[128,128], index: 0, kind: input, shape index: {}]   ;;  %s2369_s1 = inlined_call_operand.hbm [shape: bf16[128,128], index: 1, kind: input, shape index: {}]   ;;  %s2370_s2 = inlined_call_operand.hbm [shape: f32[3,128,256], index: 2, kind: input, shape index: {}]   ;;  %s2371_s3 = inlined_call_operand.hbm [shape: f32[3,1,256], index: 3, kind: input, shape index: {}]   ;;  %s2372_s4 = inlined_call_operand.hbm [shape: f32[128,128], index: 4, kind: input, shape index: {}]   ;;  %s2373_s5 = inlined_call_operand.hbm [shape: f32[1,128], index: 5, kind: input, shape index: {}]   ;;  %s2374_s6 = inlined_call_operand.hbm [shape: f32[128,128], index: 6, kind: output, shape index: {}]  }
   0x1   :  { %12 = vsyncpa [#allocation6], 0 }
   0x2   :  { %13 = vsyncpa [#allocation9], 0 }
   0x3   :  { %14 = vsyncpa [#allocation12], 0 }
   0x4   :  { %15 = vsyncpa [#allocation4], 0  ;;  %s1912_s21 = smov [#allocation5]   ;;  %s1748_s25 = scalar_lea.hbm %s2369_s1, 1024 }
   0x5   :  { %s33_s22 = sshll.u32 %s1912_s21, 4  ;;  %p1749_p0 = scmp.ne.s32.totalorder %s2369_s1, %s1748_s25  ;;  %s34_s22 = int_to_ptr.vmem [resolvable:$true] %s33_s22 }
   0x6   :  { %p1752_p1 = scmp.lt.u32.totalorder %s1748_s25, %s2369_s1 }
   0x8   :  { %p1754_p2 = pnand %p1752_p1, %p1749_p0 }
   0xa   :  { %1757 = shalt.err (!%p1754_p2)
}
   0xb   :  { %s1758_s30 = scalar_lea.vmem %s34_s22, 1024  ;;  %p1763_p4 = scmp.lt.s32.totalorder %s34_s22, %s34_s22 }
   0xc   :  { %p1759_p3 = scmp.ne.s32.totalorder %s34_s22, %s1758_s30  ;;  %p1764_p5 = scmp.lt.s32.totalorder %s1758_s30, %s1758_s30 }
   0xe   :  { %p1765_p6 = por %p1764_p5, %p1763_p4 }
  0x10   :  { %p1766_p7 = pnand %p1765_p6, %p1759_p3 }
  0x12   :  { %1769 = shalt.err (!%p1766_p7)
}
  0x13   :  { %s1913_s7 = smov 64   ;;  %s1914_s8 = smov 4  }
  0x14   :  { %39 = dma.hbm_to_vmem [thread:$0]  %s2369_s1, 1024, %s34_s22, [#allocation6], %s1913_s7, %s1913_s7, %s1914_s8  }
  0x15   :  { %s1915_s11 = smov [#allocation8]   ;;  %s1770_s15 = scalar_lea.hbm %s2371_s3, 96 }
  0x16   :  { %s57_s12 = sshll.u32 %s1915_s11, 4  ;;  %p1771_p8 = scmp.ne.s32.totalorder %s2371_s3, %s1770_s15  ;;  %s58_s12 = int_to_ptr.vmem [resolvable:$true] %s57_s12 }
  0x17   :  { %p1774_p9 = scmp.lt.u32.totalorder %s1770_s15, %s2371_s3 }
  0x19   :  { %p1776_p10 = pnand %p1774_p9, %p1771_p8 }
  0x1b   :  { %1779 = shalt.err (!%p1776_p10)
}
  0x1c   :  { %s1780_s20 = scalar_lea.vmem %s58_s12, 96  ;;  %p1785_p12 = scmp.lt.s32.totalorder %s58_s12, %s58_s12 }
  0x1d   :  { %p1781_p11 = scmp.ne.s32.totalorder %s58_s12, %s1780_s20  ;;  %p1786_p13 = scmp.lt.s32.totalorder %s1780_s20, %s1780_s20 }
  0x1f   :  { %p1787_p0 = por %p1786_p13, %p1785_p12 }
  0x21   :  { %p1788_p1 = pnand %p1787_p0, %p1781_p11 }
  0x23   :  { %1791 = shalt.err (!%p1788_p1)
}
  0x24   :  { %s1916_s1 = smov 32   ;;  %s1917_s21 = smov 2  }
  0x25   :  { %63 = dma.hbm_to_vmem [thread:$0]  %s2371_s3, 96, %s58_s12, [#allocation9], %s1916_s1, %s1916_s1, %s1917_s21  }
  0x26   :  { %s1918_s24 = smov [#allocation2]   ;;  %s1792_s28 = scalar_lea.hbm %s2368_s0, 2048 }
  0x27   :  { %s21_s25 = sshll.u32 %s1918_s24, 4  ;;  %p1793_p2 = scmp.ne.s32.totalorder %s2368_s0, %s1792_s28  ;;  %s22_s25 = int_to_ptr.vmem [resolvable:$true] %s21_s25 }
  0x28   :  { %p1796_p3 = scmp.lt.u32.totalorder %s1792_s28, %s2368_s0 }
  0x2a   :  { %p1798_p4 = pnand %p1796_p3, %p1793_p2 }
  0x2c   :  { %1801 = shalt.err (!%p1798_p4)
}
  0x2d   :  { %s1802_s9 = scalar_lea.vmem %s22_s25, 2048  ;;  %p1807_p6 = scmp.lt.s32.totalorder %s22_s25, %s22_s25 }
  0x2e   :  { %p1803_p5 = scmp.ne.s32.totalorder %s22_s25, %s1802_s9  ;;  %p1808_p7 = scmp.lt.s32.totalorder %s1802_s9, %s1802_s9 }
  0x30   :  { %p1809_p8 = por %p1808_p7, %p1807_p6 }
  0x32   :  { %p1810_p9 = pnand %p1809_p8, %p1803_p5 }
  0x34   :  { %1813 = shalt.err (!%p1810_p9)
}
  0x35   :  { %s1919_s3 = smov 128   ;;  %s1920_s10 = smov 8  }
  0x36   :  { %27 = dma.hbm_to_vmem [thread:$0]  %s2368_s0, 2048, %s22_s25, [#allocation3], %s1919_s3, %s1919_s3, %s1920_s10  }
  0x37   :  { %s1921_s13 = smov [#allocation7]   ;;  %s1814_s17 = scalar_lea.hbm %s2370_s2, 12288 }
  0x38   :  { %s45_s14 = sshll.u32 %s1921_s13, 4  ;;  %p1815_p10 = scmp.ne.s32.totalorder %s2370_s2, %s1814_s17  ;;  %s46_s14 = int_to_ptr.vmem [resolvable:$true] %s45_s14 }
  0x39   :  { %p1818_p11 = scmp.lt.u32.totalorder %s1814_s17, %s2370_s2 }
  0x3b   :  { %p1820_p12 = pnand %p1818_p11, %p1815_p10 }
  0x3d   :  { %1823 = shalt.err (!%p1820_p12)
}
  0x3e   :  { %s1824_s21 = scalar_lea.vmem %s46_s14, 12288  ;;  %p1829_p0 = scmp.lt.s32.totalorder %s46_s14, %s46_s14 }
  0x3f   :  { %p1825_p13 = scmp.ne.s32.totalorder %s46_s14, %s1824_s21  ;;  %p1830_p1 = scmp.lt.s32.totalorder %s1824_s21, %s1824_s21 }
  0x41   :  { %p1831_p2 = por %p1830_p1, %p1829_p0 }
  0x43   :  { %p1832_p3 = pnand %p1831_p2, %p1825_p13 }
  0x45   :  { %1835 = shalt.err (!%p1832_p3)
}
  0x46   :  { %s1922_s0 = smov 256   ;;  %s1923_s22 = smov 16  }
  0x47   :  { %51 = dma.hbm_to_vmem [thread:$0]  %s2370_s2, 12288, %s46_s14, [#allocation6], %s1922_s0, %s1922_s0, %s1923_s22  }
  0x48   :  { %s1924_s25 = smov [#allocation10]   ;;  %s1925_s27 = smov [#allocation11]  }
  0x49   :  { %s69_s26 = sshll.u32 %s1924_s25, 4  ;;  %s82_s28 = sshll.u32 %s1925_s27, 4  ;;  %s70_s26 = int_to_ptr.vmem [resolvable:$true] %s69_s26  ;;  %s83_s28 = int_to_ptr.vmem [resolvable:$true] %s82_s28 }
  0x4a   :  { %s1836_s7 = scalar_lea.hbm %s2372_s4, 2048 }
  0x4b   :  { %p1837_p4 = scmp.ne.s32.totalorder %s2372_s4, %s1836_s7  ;;  %p1840_p5 = scmp.lt.u32.totalorder %s1836_s7, %s2372_s4 }
  0x4d   :  { %p1842_p6 = pnand %p1840_p5, %p1837_p4 }
  0x4f   :  { %1845 = shalt.err (!%p1842_p6)
}
  0x50   :  { %s1846_s2 = scalar_lea.vmem %s70_s26, 2048  ;;  %p1851_p8 = scmp.lt.s32.totalorder %s70_s26, %s70_s26 }
  0x51   :  { %p1847_p7 = scmp.ne.s32.totalorder %s70_s26, %s1846_s2  ;;  %p1852_p9 = scmp.lt.s32.totalorder %s1846_s2, %s1846_s2 }
  0x53   :  { %p1853_p10 = por %p1852_p9, %p1851_p8 }
  0x55   :  { %p1854_p11 = pnand %p1853_p10, %p1847_p7 }
  0x57   :  { %1857 = shalt.err (!%p1854_p11)
}
  0x58   :  { %75 = dma.hbm_to_vmem [thread:$0]  %s2372_s4, 2048, %s70_s26, [#allocation9], %s1919_s3, %s1919_s3, %s1920_s10  }
  0x59   :  { %s1858_s17 = scalar_lea.hbm %s2373_s5, 16 }
  0x5a   :  { %p1859_p12 = scmp.ne.s32.totalorder %s2373_s5, %s1858_s17  ;;  %p1862_p13 = scmp.lt.u32.totalorder %s1858_s17, %s2373_s5 }
  0x5c   :  { %p1864_p0 = pnand %p1862_p13, %p1859_p12 }
  0x5e   :  { %1867 = shalt.err (!%p1864_p0)
}
  0x5f   :  { %s1868_s21 = scalar_lea.vmem %s83_s28, 16  ;;  %s1872_s0 = scalar_lea.vmem %s83_s28, 32 }
  0x60   :  { %p1869_p1 = scmp.ne.s32.totalorder %s83_s28, %s1868_s21  ;;  %p1873_p2 = scmp.lt.s32.totalorder %s83_s28, %s83_s28 }
  0x61   :  { %p1874_p3 = scmp.lt.s32.totalorder %s1872_s0, %s1868_s21 }
  0x63   :  { %p1875_p4 = por %p1874_p3, %p1873_p2 }
  0x65   :  { %p1876_p5 = pnand %p1875_p4, %p1869_p1 }
  0x67   :  { %1879 = shalt.err (!%p1876_p5)
}
  0x68   :  { %85 = dma.hbm_to_vmem [thread:$0]  %s2373_s5, 16, %s83_s28, [#allocation12]  }
  0x69   :  { %1902 = dma.done.wait [#allocation3], 2048  }
  0x6a   :  { %1903 = vsyncadd [#allocation3], 4294965248 }
  0x6b   :  { %1904 = dma.done.wait [#allocation6], 13312  }
  0x6c   :  { %1905 = vsyncadd [#allocation6], 4294953984 }
  0x6d   :  { %1906 = dma.done.wait [#allocation9], 2144  }
  0x6e   :  { %1907 = vsyncadd [#allocation9], 4294965152 }
  0x6f   :  { %1908 = dma.done.wait [#allocation12], 16  }
  0x70   :  { %1909 = vsyncadd [#allocation12], 4294967280  ;;  %v1926_v0 = vmov 0.0   ;;  %v138_v1 = vld [vmem:[#allocation7 + $0x8] sm:$0xff]  ;;  %v140_v2 = vld [vmem:[#allocation7 + $0x18] sm:$0xff]  ;;  %s1927_s5 = smov [#allocation13]  }
  0x71   :  { %245 = vmatprep.mubr.f32.mxu0 %v1926_v0  ;;  %v137_v3 = vld [vmem:[#allocation7] sm:$0xff]  ;;  %v1596_v4 = vpack.c.bf16 %v140_v2, %v138_v1  ;;  %v139_v5 = vld [vmem:[#allocation7 + $0x10] sm:$0xff]  ;;  %v142_v6 = vld [vmem:[#allocation7 + $0x28] sm:$0xff]  ;;  %s1340_s23 = sshll.u32 %s1927_s5, 4  ;;  %s1341_s23 = int_to_ptr.vmem [resolvable:$true] %s1340_s23 }
  0x72   :  { %v144_v7 = vld [vmem:[#allocation7 + $0x38] sm:$0xff]  ;;  %v1598_v8 = vpack.c.bf16 %v139_v5, %v137_v3  ;;  %v141_v10 = vld [vmem:[#allocation7 + $0x20] sm:$0xff]  ;;  %v143_v11 = vld [vmem:[#allocation7 + $0x30] sm:$0xff]  ;;  %v171_v3 = vlaneseq  ;;  %s1880_s24 = scalar_lea.vmem %s1341_s23, 2048  ;;  %p1885_p7 = scmp.lt.s32.totalorder %s1341_s23, %s1341_s23 }
  0x73   :  { %v1600_v9 = vpack.c.bf16 %v144_v7, %v142_v6  ;;  %v146_v12 = vld [vmem:[#allocation7 + $0x48] sm:$0xff]  ;;  %1597 = vmatprep.subr.bf16.mxu0 %v1596_v4  ;;  %v148_v13 = vld [vmem:[#allocation7 + $0x58] sm:$0xff]  ;;  %v1602_v14 = vpack.c.bf16 %v143_v11, %v141_v10  ;;  %v145_v16 = vld [vmem:[#allocation7 + $0x40] sm:$0xff]  ;;  %p1881_p6 = scmp.ne.s32.totalorder %s1341_s23, %s1880_s24  ;;  %p1886_p8 = scmp.lt.s32.totalorder %s1880_s24, %s1880_s24 }
  0x74   :  { %1599 = vmatpush1.bf16.msra.mxu0 %v1598_v8  ;;  %v1604_v15 = vpack.c.bf16 %v148_v13, %v146_v12  ;;  %v147_v17 = vld [vmem:[#allocation7 + $0x50] sm:$0xff]  ;;  %v150_v18 = vld [vmem:[#allocation7 + $0x68] sm:$0xff]  ;;  %v152_v19 = vld [vmem:[#allocation7 + $0x78] sm:$0xff]  ;;  %v2061_v4 = vshrl.u32 %v171_v3, 7 }
  0x75   :  { %1601 = vmatprep.subr.bf16.mxu0 %v1600_v9  ;;  %v1606_v20 = vpack.c.bf16 %v147_v17, %v145_v16  ;;  %v1608_v21 = vpack.c.bf16 %v152_v19, %v150_v18  ;;  %v149_v22 = vld [vmem:[#allocation7 + $0x60] sm:$0xff]  ;;  %v151_v23 = vld [vmem:[#allocation7 + $0x70] sm:$0xff]  ;;  %v154_v24 = vld [vmem:[#allocation7 + $0x88] sm:$0xff]  ;;  %p1887_p9 = por %p1886_p8, %p1885_p7 }
  0x76   :  { %v156_v25 = vld [vmem:[#allocation7 + $0x98] sm:$0xff]  ;;  %v1610_v26 = vpack.c.bf16 %v151_v23, %v149_v22  ;;  %v153_v28 = vld [vmem:[#allocation7 + $0x80] sm:$0xff]  ;;  %v155_v29 = vld [vmem:[#allocation7 + $0x90] sm:$0xff]  ;;  %v2064_v5 = vsub.s32 0, %v2061_v4 }
  0x77   :  { %v1612_v27 = vpack.c.bf16 %v156_v25, %v154_v24  ;;  %v158_v30 = vld [vmem:[#allocation7 + $0xa8] sm:$0xff]  ;;  %v160_v31 = vld [vmem:[#allocation7 + $0xb8] sm:$0xff]  ;;  %v157_v32 = vld [vmem:[#allocation7 + $0xa0] sm:$0xff]  ;;  %v1614_v34 = vpack.c.bf16 %v155_v29, %v153_v28  ;;  %p1888_p10 = pnand %p1887_p9, %p1881_p6 }
  0x78   :  { %1603 = vmatpush1.bf16.msra.mxu0 %v1602_v14  ;;  %v159_v33 = vld [vmem:[#allocation7 + $0xb0] sm:$0xff]  ;;  %v162_v35 = vld [vmem:[#allocation7 + $0xc8] sm:$0xff]  ;;  %v164_v36 = vld [vmem:[#allocation7 + $0xd8] sm:$0xff]  ;;  %v1616_v37 = vpack.c.bf16 %v160_v31, %v158_v30 }
  0x79   :  { %1605 = vmatprep.subr.bf16.mxu0 %v1604_v15  ;;  %v161_v38 = vld [vmem:[#allocation7 + $0xc0] sm:$0xff]  ;;  %v1618_v39 = vpack.c.bf16 %v159_v33, %v157_v32  ;;  %v1620_v40 = vpack.c.bf16 %v164_v36, %v162_v35  ;;  %v163_v41 = vld [vmem:[#allocation7 + $0xd0] sm:$0xff]  ;;  %v166_v42 = vld [vmem:[#allocation7 + $0xe8] sm:$0xff] }
  0x7a   :  { %v168_v43 = vld [vmem:[#allocation7 + $0xf8] sm:$0xff]  ;;  %v1622_v44 = vpack.c.bf16 %v163_v41, %v161_v38  ;;  %v165_v46 = vld [vmem:[#allocation7 + $0xe0] sm:$0xff]  ;;  %v167_v47 = vld [vmem:[#allocation7 + $0xf0] sm:$0xff] }
  0x7b   :  { %v1624_v45 = vpack.c.bf16 %v168_v43, %v166_v42  ;;  %v1626_v48 = vpack.c.bf16 %v167_v47, %v165_v46  ;;  %v121_v49 = vld [vmem:[#allocation2] sm:$0xff]  ;;  %v122_v50 = vld [vmem:[#allocation2 + $0x8] sm:$0xff]  ;;  %v123_v51 = vld [vmem:[#allocation2 + $0x10] sm:$0xff] }
  0x7c   :  { %1607 = vmatpush1.bf16.msra.mxu0 %v1606_v20  ;;  %v124_v52 = vld [vmem:[#allocation2 + $0x18] sm:$0xff]  ;;  %v125_v53 = vld [vmem:[#allocation2 + $0x20] sm:$0xff]  ;;  %v126_v54 = vld [vmem:[#allocation2 + $0x28] sm:$0xff] }
  0x7d   :  { %1609 = vmatprep.subr.bf16.mxu0 %v1608_v21  ;;  %v127_v55 = vld [vmem:[#allocation2 + $0x30] sm:$0xff]  ;;  %v128_v56 = vld [vmem:[#allocation2 + $0x38] sm:$0xff]  ;;  %v129_v57 = vld [vmem:[#allocation2 + $0x40] sm:$0xff] }
  0x7e   :  { %v130_v58 = vld [vmem:[#allocation2 + $0x48] sm:$0xff]  ;;  %v131_v59 = vld [vmem:[#allocation2 + $0x50] sm:$0xff]  ;;  %v132_v60 = vld [vmem:[#allocation2 + $0x58] sm:$0xff] }
  0x7f   :  { %v133_v61 = vld [vmem:[#allocation2 + $0x60] sm:$0xff]  ;;  %v134_v62 = vld [vmem:[#allocation2 + $0x68] sm:$0xff]  ;;  %v135_v63 = vld [vmem:[#allocation2 + $0x70] sm:$0xff] }
  0x80   :  { %1611 = vmatpush1.bf16.msra.mxu0 %v1610_v26  ;;  %v136_v1 = vld [vmem:[#allocation2 + $0x78] sm:$0xff]  ;;  %v2057_v2 = vld [vmem:[#allocation5] sm:$0xff]  }
  0x81   :  { %1613 = vmatprep.subr.bf16.mxu0 %v1612_v27  ;;  %1460 = vmatprep.mubr.bf16.mxu1 %v2057_v2  ;;  %v2066_v6 = vld [vmem:[#allocation8] sm:$0x3] }
  0x82   :  { %v2070_v8 = vrot.slane %v2066_v6, %v2064_v5 }
  0x84   :  { %1615 = vmatpush1.bf16.msra.mxu0 %v1614_v34 }
  0x85   :  { %1617 = vmatprep.subr.bf16.mxu0 %v1616_v37 }
  0x88   :  { %1619 = vmatpush1.bf16.msra.mxu0 %v1618_v39 }
  0x89   :  { %1621 = vmatprep.subr.bf16.mxu0 %v1620_v40 }
  0x8c   :  { %1623 = vmatpush1.bf16.msra.mxu0 %v1622_v44 }
  0x8d   :  { %1625 = vmatprep.subr.bf16.mxu0 %v1624_v45 }
  0x90   :  { %1627 = vmatpush1.bf16.msra.mxu0 %v1626_v48 }
  0x93   :  { %246 = vmatmul.mubr.f32.vlgmr.msra.gmra.mrb[0].mxu0 %v121_v49 }
  0x94   :  { %251 = vmatprep.mubr.f32.mxu0 %v1926_v0 }
  0x97   :  { %252 = vmatmul.mubr.f32.gmra.mrb[2].mxu0 %v122_v50 }
  0x98   :  { %257 = vmatprep.mubr.f32.mxu0 %v1926_v0 }
  0x9b   :  { %258 = vmatmul.mubr.f32.gmra.mrb[4].mxu0 %v123_v51 }
  0x9c   :  { %263 = vmatprep.mubr.f32.mxu0 %v1926_v0 }
  0x9f   :  { %264 = vmatmul.mubr.f32.gmra.mrb[6].mxu0 %v124_v52 }
  0xa0   :  { %269 = vmatprep.mubr.f32.mxu0 %v1926_v0 }
  0xa3   :  { %270 = vmatmul.mubr.f32.gmra.mrb[8].mxu0 %v125_v53 }
  0xa4   :  { %275 = vmatprep.mubr.f32.mxu0 %v1926_v0 }
  0xa7   :  { %276 = vmatmul.mubr.f32.gmra.mrb[10].mxu0 %v126_v54 }
  0xa8   :  { %281 = vmatprep.mubr.f32.mxu0 %v1926_v0 }
  0xab   :  { %282 = vmatmul.mubr.f32.gmra.mrb[12].mxu0 %v127_v55 }
  0xac   :  { %287 = vmatprep.mubr.f32.mxu0 %v1926_v0 }
  0xaf   :  { %288 = vmatmul.mubr.f32.gmra.mrb[14].mxu0 %v128_v56 }
  0xb0   :  { %293 = vmatprep.mubr.f32.mxu0 %v1926_v0 }
  0xb3   :  { %294 = vmatmul.mubr.f32.gmra.mrb[16].mxu0 %v129_v57 }
  0xb4   :  { %299 = vmatprep.mubr.f32.mxu0 %v1926_v0 }
  0xb7   :  { %300 = vmatmul.mubr.f32.gmra.mrb[18].mxu0 %v130_v58 }
  0xb8   :  { %305 = vmatprep.mubr.f32.mxu0 %v1926_v0 }
  0xbb   :  { %306 = vmatmul.mubr.f32.gmra.mrb[20].mxu0 %v131_v59 }
  0xbc   :  { %311 = vmatprep.mubr.f32.mxu0 %v1926_v0 }
  0xbf   :  { %312 = vmatmul.mubr.f32.gmra.mrb[22].mxu0 %v132_v60  ;;  %v513_v60 = vld [vmem:[#allocation7 + $0x108] sm:$0xff] }
  0xc0   :  { %317 = vmatprep.mubr.f32.mxu0 %v1926_v0 }
  0xc3   :  { %318 = vmatmul.mubr.f32.gmra.mrb[24].mxu0 %v133_v61  ;;  %v515_v61 = vld [vmem:[#allocation7 + $0x118] sm:$0xff] }
  0xc4   :  { %323 = vmatprep.mubr.f32.mxu0 %v1926_v0 }
  0xc7   :  { %324 = vmatmul.mubr.f32.gmra.mrb[26].mxu0 %v134_v62 }
  0xc8   :  { %329 = vmatprep.mubr.f32.mxu0 %v1926_v0 }
  0xcb   :  { %330 = vmatmul.mubr.f32.gmra.mrb[28].mxu0 %v135_v63 }
  0xcc   :  { %335 = vmatprep.mubr.f32.mxu0 %v1926_v0 }
  0xcf   :  { %336 = vmatmul.mubr.f32.gmra.mrb[30].mxu0 %v136_v1 }
  0xd0   :  { %1492 = vmatprep.mubr.bf16.mxu0 %v2057_v2 }
 0x166   :  { %v247_v7 = vpop.f32.mrb[0].mxu0 }
 0x167   :  { %v2072_v9 = vpop.f32.mrb[1].mxu0  ;;  %v248_v11 = vadd.f32 %v247_v7, %v2070_v8  ;;  %v1628_v7 = vpack.c.bf16 %v515_v61, %v513_v60  ;;  %v534_v60 = vld [vmem:[#allocation7 + $0x1b0] sm:$0xff]  ;;  %v537_v61 = vld [vmem:[#allocation7 + $0x1c8] sm:$0xff] }
 0x16a   :  { %v253_v10 = vpop.f32.mrb[2].mxu0 }
 0x16b   :  { %v254_v12 = vadd.f32 %v253_v10, %v2070_v8  ;;  %v2076_v13 = vpop.f32.mrb[3].mxu0  ;;  %v512_v10 = vld [vmem:[#allocation7 + $0x100] sm:$0xff] }
 0x16d   :  { %v342_v14 = vpack.c.bf16 %v254_v12, %v248_v11  ;;  %v514_v11 = vld [vmem:[#allocation7 + $0x110] sm:$0xff]  ;;  %v517_v12 = vld [vmem:[#allocation7 + $0x128] sm:$0xff] }
 0x16e   :  { %v259_v15 = vpop.f32.mrb[4].mxu0 }
 0x16f   :  { %v2078_v16 = vpop.f32.mrb[5].mxu0  ;;  %1444 = vmatprep.subr.bf16.mxu1 %v342_v14  ;;  %v260_v18 = vadd.f32 %v259_v15, %v2070_v8  ;;  %v2120_v15 = vld [vmem:[#allocation5 + $0x8] sm:$0xff]  }
 0x170   :  { %1445 = vmatpush3.bf16.msra.mxu1 %v342_v14  ;;  %v519_v14 = vld [vmem:[#allocation7 + $0x138] sm:$0xff] }
 0x172   :  { %v265_v17 = vpop.f32.mrb[6].mxu0 }
 0x173   :  { %v266_v19 = vadd.f32 %v265_v17, %v2070_v8  ;;  %v2082_v20 = vpop.f32.mrb[7].mxu0  ;;  %v2122_v17 = vld [vmem:[#allocation5 + $0x10] sm:$0xff]  }
 0x175   :  { %v343_v21 = vpack.c.bf16 %v266_v19, %v260_v18  ;;  %v1630_v18 = vpack.c.bf16 %v514_v11, %v512_v10  ;;  %v1632_v19 = vpack.c.bf16 %v519_v14, %v517_v12  ;;  %v538_v10 = vld [vmem:[#allocation7 + $0x1d0] sm:$0xff]  ;;  %v2138_v11 = vld [vmem:[#allocation5 + $0x38] sm:$0xff]   ;;  %v541_v14 = vld [vmem:[#allocation7 + $0x1e8] sm:$0xff] }
 0x176   :  { %v271_v22 = vpop.f32.mrb[8].mxu0 }
 0x177   :  { %v2084_v23 = vpop.f32.mrb[9].mxu0  ;;  %1446 = vmatprep.subr.bf16.mxu1 %v343_v21  ;;  %v272_v25 = vadd.f32 %v271_v22, %v2070_v8  ;;  %v518_v22 = vld [vmem:[#allocation7 + $0x130] sm:$0xff] }
 0x178   :  { %1447 = vmatpush3.bf16.msra.mxu1 %v343_v21  ;;  %v516_v21 = vld [vmem:[#allocation7 + $0x120] sm:$0xff] }
 0x17a   :  { %v277_v24 = vpop.f32.mrb[10].mxu0 }
 0x17b   :  { %v278_v26 = vadd.f32 %v277_v24, %v2070_v8  ;;  %v2088_v27 = vpop.f32.mrb[11].mxu0  ;;  %v523_v24 = vld [vmem:[#allocation7 + $0x158] sm:$0xff] }
 0x17d   :  { %v344_v28 = vpack.c.bf16 %v278_v26, %v272_v25  ;;  %v1634_v25 = vpack.c.bf16 %v518_v22, %v516_v21  ;;  %v540_v21 = vld [vmem:[#allocation7 + $0x1e0] sm:$0xff]  ;;  %v542_v22 = vld [vmem:[#allocation7 + $0x1f0] sm:$0xff] }
 0x17e   :  { %v283_v29 = vpop.f32.mrb[12].mxu0 }
 0x17f   :  { %v2090_v30 = vpop.f32.mrb[13].mxu0  ;;  %1448 = vmatprep.subr.bf16.mxu1 %v344_v28  ;;  %v284_v32 = vadd.f32 %v283_v29, %v2070_v8  ;;  %v522_v29 = vld [vmem:[#allocation7 + $0x150] sm:$0xff] }
 0x180   :  { %1449 = vmatpush3.bf16.msra.mxu1 %v344_v28  ;;  %v520_v28 = vld [vmem:[#allocation7 + $0x140] sm:$0xff] }
 0x182   :  { %v289_v31 = vpop.f32.mrb[14].mxu0 }
 0x183   :  { %v290_v33 = vadd.f32 %v289_v31, %v2070_v8  ;;  %v2094_v34 = vpop.f32.mrb[15].mxu0  ;;  %v525_v31 = vld [vmem:[#allocation7 + $0x168] sm:$0xff] }
 0x185   :  { %v345_v35 = vpack.c.bf16 %v290_v33, %v284_v32  ;;  %v527_v32 = vld [vmem:[#allocation7 + $0x178] sm:$0xff] }
 0x186   :  { %v295_v36 = vpop.f32.mrb[16].mxu0  ;;  %v2126_v33 = vld [vmem:[#allocation5 + $0x18] sm:$0xff]  }
 0x187   :  { %v2096_v37 = vpop.f32.mrb[17].mxu0  ;;  %1450 = vmatprep.subr.bf16.mxu1 %v345_v35  ;;  %v296_v39 = vadd.f32 %v295_v36, %v2070_v8  ;;  %v1638_v36 = vpack.c.bf16 %v522_v29, %v520_v28 }
 0x188   :  { %1451 = vmatpush3.bf16.msra.mxu1 %v345_v35  ;;  %v2128_v35 = vld [vmem:[#allocation5 + $0x20] sm:$0xff]  }
 0x18a   :  { %v301_v38 = vpop.f32.mrb[18].mxu0 }
 0x18b   :  { %v302_v40 = vadd.f32 %v301_v38, %v2070_v8  ;;  %v2100_v41 = vpop.f32.mrb[19].mxu0  ;;  %v1640_v38 = vpack.c.bf16 %v527_v32, %v525_v31 }
 0x18d   :  { %v346_v42 = vpack.c.bf16 %v302_v40, %v296_v39  ;;  %v524_v39 = vld [vmem:[#allocation7 + $0x160] sm:$0xff]  ;;  %v526_v40 = vld [vmem:[#allocation7 + $0x170] sm:$0xff] }
 0x18e   :  { %v307_v43 = vpop.f32.mrb[20].mxu0 }
 0x18f   :  { %v2102_v44 = vpop.f32.mrb[21].mxu0  ;;  %1452 = vmatprep.subr.bf16.mxu1 %v346_v42  ;;  %v308_v46 = vadd.f32 %v307_v43, %v2070_v8  ;;  %v531_v43 = vld [vmem:[#allocation7 + $0x198] sm:$0xff] }
 0x190   :  { %1453 = vmatpush3.bf16.msra.mxu1 %v346_v42  ;;  %v529_v42 = vld [vmem:[#allocation7 + $0x188] sm:$0xff] }
 0x192   :  { %v313_v45 = vpop.f32.mrb[22].mxu0 }
 0x193   :  { %v314_v47 = vadd.f32 %v313_v45, %v2070_v8  ;;  %v2106_v48 = vpop.f32.mrb[23].mxu0  ;;  %v1642_v45 = vpack.c.bf16 %v526_v40, %v524_v39 }
 0x195   :  { %v347_v49 = vpack.c.bf16 %v314_v47, %v308_v46  ;;  %v1644_v46 = vpack.c.bf16 %v531_v43, %v529_v42  ;;  %v528_v47 = vld [vmem:[#allocation7 + $0x180] sm:$0xff] }
 0x196   :  { %v319_v50 = vpop.f32.mrb[24].mxu0 }
 0x197   :  { %v2108_v51 = vpop.f32.mrb[25].mxu0  ;;  %1454 = vmatprep.subr.bf16.mxu1 %v347_v49  ;;  %v320_v53 = vadd.f32 %v319_v50, %v2070_v8  ;;  %v533_v50 = vld [vmem:[#allocation7 + $0x1a8] sm:$0xff] }
 0x198   :  { %1455 = vmatpush3.bf16.msra.mxu1 %v347_v49  ;;  %v530_v49 = vld [vmem:[#allocation7 + $0x190] sm:$0xff] }
 0x19a   :  { %v325_v52 = vpop.f32.mrb[26].mxu0 }
 0x19b   :  { %v326_v54 = vadd.f32 %v325_v52, %v2070_v8  ;;  %v2112_v55 = vpop.f32.mrb[27].mxu0  ;;  %v535_v52 = vld [vmem:[#allocation7 + $0x1b8] sm:$0xff] }
 0x19d   :  { %v348_v56 = vpack.c.bf16 %v326_v54, %v320_v53  ;;  %v2132_v53 = vld [vmem:[#allocation5 + $0x28] sm:$0xff]   ;;  %v2134_v54 = vld [vmem:[#allocation5 + $0x30] sm:$0xff]  }
 0x19e   :  { %v331_v57 = vpop.f32.mrb[28].mxu0 }
 0x19f   :  { %v2114_v58 = vpop.f32.mrb[29].mxu0  ;;  %1456 = vmatprep.subr.bf16.mxu1 %v348_v56  ;;  %v332_v62 = vadd.f32 %v331_v57, %v2070_v8  ;;  %v1648_v57 = vpack.c.bf16 %v535_v52, %v533_v50 }
 0x1a0   :  { %1457 = vmatpush3.bf16.msra.mxu1 %v348_v56  ;;  %v1646_v56 = vpack.c.bf16 %v530_v49, %v528_v47 }
 0x1a2   :  { %v337_v59 = vpop.f32.mrb[30].mxu0 }
 0x1a3   :  { %v338_v63 = vadd.f32 %v337_v59, %v2070_v8  ;;  %v2118_v1 = vpop.f32.mrb[31].mxu0  ;;  %v521_v8 = vld [vmem:[#allocation7 + $0x148] sm:$0xff]  ;;  %v532_v59 = vld [vmem:[#allocation7 + $0x1a0] sm:$0xff] }
 0x1a4   :  { %v1636_v26 = vpack.c.bf16 %v523_v24, %v521_v8  ;;  %v1658_v8 = vpack.c.bf16 %v542_v22, %v540_v21  ;;  %v2143_v24 = vsub.s32 1, %v2061_v4 }
 0x1a5   :  { %v349_v3 = vpack.c.bf16 %v338_v63, %v332_v62  ;;  %v539_v62 = vld [vmem:[#allocation7 + $0x1d8] sm:$0xff]  ;;  %v1650_v63 = vpack.c.bf16 %v534_v60, %v532_v59 }
 0x1a7   :  { %1458 = vmatprep.subr.bf16.mxu1 %v349_v3 }
 0x1a8   :  { %1459 = vmatpush3.bf16.msra.mxu1 %v349_v3  ;;  %v1652_v3 = vpack.c.bf16 %v539_v62, %v537_v61 }
 0x1a9   :  { %1629 = vmatprep.subr.bf16.mxu1 %v1628_v7  ;;  %v536_v7 = vld [vmem:[#allocation7 + $0x1c0] sm:$0xff] }
 0x1aa   :  { %v1654_v12 = vpack.c.bf16 %v538_v10, %v536_v7 }
 0x1ab   :  { %1461 = vmatmul.mubr.bf16.vlgmr.msra.gmra.mrb[0].mxu1 %v2120_v15 }
 0x1ac   :  { %1464 = vmatprep.mubr.bf16.mxu1 %v2122_v17  ;;  %1631 = vmatpush1.bf16.msra.mxu1 %v1630_v18  ;;  %v543_v18 = vld [vmem:[#allocation7 + $0x1f8] sm:$0xff] }
 0x1ad   :  { %1633 = vmatprep.subr.bf16.mxu1 %v1632_v19  ;;  %v1656_v19 = vpack.c.bf16 %v543_v18, %v541_v14 }
 0x1b0   :  { %1635 = vmatpush1.bf16.msra.mxu1 %v1634_v25  ;;  %v178_v25 = vrot.slane %v2066_v6, %v2143_v24 }
 0x1b1   :  { %1637 = vmatprep.subr.bf16.mxu1 %v1636_v26 }
 0x1b2   :  { %v262_v26 = vadd.f32 %v2078_v16, %v178_v25  ;;  %v250_v28 = vadd.f32 %v2072_v9, %v178_v25  ;;  %v268_v31 = vadd.f32 %v2082_v20, %v178_v25  ;;  %v286_v6 = vadd.f32 %v2090_v30, %v178_v25 }
 0x1b3   :  { %1465 = vmatmul.mubr.bf16.gmra.mrb[4].mxu1 %v2126_v33  ;;  %v274_v9 = vadd.f32 %v2084_v23, %v178_v25  ;;  %v292_v20 = vadd.f32 %v2094_v34, %v178_v25  ;;  %v310_v23 = vadd.f32 %v2102_v44, %v178_v25  ;;  %v298_v34 = vadd.f32 %v2096_v37, %v178_v25 }
 0x1b4   :  { %1468 = vmatprep.mubr.bf16.mxu1 %v2128_v35  ;;  %1639 = vmatpush1.bf16.msra.mxu1 %v1638_v36  ;;  %v334_v37 = vadd.f32 %v2114_v58, %v178_v25 }
 0x1b5   :  { %1641 = vmatprep.subr.bf16.mxu1 %v1640_v38  ;;  %v256_v38 = vadd.f32 %v2076_v13, %v178_v25  ;;  %v280_v13 = vadd.f32 %v2088_v27, %v178_v25  ;;  %v316_v27 = vadd.f32 %v2106_v48, %v178_v25  ;;  %v322_v48 = vadd.f32 %v2108_v51, %v178_v25 }
 0x1b8   :  { %1643 = vmatpush1.bf16.msra.mxu1 %v1642_v45 }
 0x1b9   :  { %1645 = vmatprep.subr.bf16.mxu1 %v1644_v46 }
 0x1bb   :  { %1469 = vmatmul.mubr.bf16.gmra.mrb[8].mxu1 %v2132_v53 }
 0x1bc   :  { %1472 = vmatprep.mubr.bf16.mxu1 %v2134_v54  ;;  %1647 = vmatpush1.bf16.msra.mxu1 %v1646_v56 }
 0x1bd   :  { %1649 = vmatprep.subr.bf16.mxu1 %v1648_v57 }
 0x1c0   :  { %1651 = vmatpush1.bf16.msra.mxu1 %v1650_v63 }
 0x1c1   :  { %1653 = vmatprep.subr.bf16.mxu1 %v1652_v3  ;;  %v304_v3 = vadd.f32 %v2100_v41, %v178_v25  ;;  %v340_v41 = vadd.f32 %v2118_v1, %v178_v25 }
 0x1c3   :  { %1473 = vmatmul.mubr.bf16.gmra.mrb[12].mxu1 %v2138_v11 }
 0x1c4   :  { %1655 = vmatpush1.bf16.msra.mxu1 %v1654_v12  ;;  %621 = vmatprep.mubr.f32.mxu1 %v1926_v0 }
 0x1c5   :  { %1657 = vmatprep.subr.bf16.mxu1 %v1656_v19 }
 0x1c8   :  { %1659 = vmatpush1.bf16.msra.mxu1 %v1658_v8 }
 0x27e   :  { %v1462_v29 = vpop.f32.mrb[0].mxu1 }
 0x27f   :  { %v441_v32 = vadd.f32 %v1462_v29, %v262_v26  ;;  %v432_v36 = vpop.f32.mrb[1].mxu1  ;;  %v328_v26 = vadd.f32 %v2112_v55, %v178_v25 }
 0x280   :  { %v433_v39 = vadd.f32 %v432_v36, %v250_v28  ;;  %v1463_v40 = vpop.f32.mrb[2].mxu1 }
 0x281   :  { %v444_v42 = vadd.f32 %v1463_v40, %v268_v31  ;;  %v435_v43 = vpop.f32.mrb[3].mxu1  ;;  %v497_v30 = vmax.f32 %v441_v32, 0.0 }
 0x282   :  { %v495_v4 = vmax.f32 %v433_v39, 0.0  ;;  %v436_v45 = vadd.f32 %v435_v43, %v256_v38 }
 0x283   :  { %v498_v60 = vmax.f32 %v444_v42, 0.0 }
 0x284   :  { %622 = vmatmul.mubr.f32.vlgmr.msra.gmra.mrb[16].mxu1 %v495_v4  ;;  %v496_v16 = vmax.f32 %v436_v45, 0.0  ;;  %v2179_v4 = vld [vmem:[#allocation8 + $0x2] sm:$0x3] }
 0x285   :  { %627 = vmatprep.mubr.f32.mxu1 %v1926_v0 }
 0x286   :  { %v1466_v46 = vpop.f32.mrb[4].mxu1 }
 0x287   :  { %v457_v47 = vadd.f32 %v1466_v46, %v286_v6  ;;  %v448_v49 = vpop.f32.mrb[5].mxu1  ;;  %v2183_v6 = vrot.slane %v2179_v4, %v2064_v5 }
 0x288   :  { %v449_v50 = vadd.f32 %v448_v49, %v274_v9  ;;  %v1467_v52 = vpop.f32.mrb[6].mxu1  ;;  %628 = vmatmul.mubr.f32.gmra.mrb[18].mxu1 %v496_v16 }
 0x289   :  { %v460_v56 = vadd.f32 %v1467_v52, %v292_v20  ;;  %v451_v57 = vpop.f32.mrb[7].mxu1  ;;  %633 = vmatprep.mubr.f32.mxu1 %v1926_v0  ;;  %v501_v58 = vmax.f32 %v457_v47, 0.0 }
 0x28a   :  { %v452_v59 = vadd.f32 %v451_v57, %v280_v13  ;;  %v499_v44 = vmax.f32 %v449_v50, 0.0 }
 0x28b   :  { %v502_v51 = vmax.f32 %v460_v56, 0.0 }
 0x28c   :  { %634 = vmatmul.mubr.f32.gmra.mrb[20].mxu1 %v497_v30  ;;  %v500_v19 = vmax.f32 %v452_v59, 0.0 }
 0x28d   :  { %639 = vmatprep.mubr.f32.mxu1 %v1926_v0 }
 0x28e   :  { %v1470_v61 = vpop.f32.mrb[8].mxu1 }
 0x28f   :  { %v473_v62 = vadd.f32 %v1470_v61, %v310_v23  ;;  %v464_v63 = vpop.f32.mrb[9].mxu1 }
 0x290   :  { %v465_v7 = vadd.f32 %v464_v63, %v298_v34  ;;  %v1471_v10 = vpop.f32.mrb[10].mxu1  ;;  %640 = vmatmul.mubr.f32.gmra.mrb[22].mxu1 %v498_v60 }
 0x291   :  { %v476_v12 = vadd.f32 %v1471_v10, %v316_v27  ;;  %v467_v14 = vpop.f32.mrb[11].mxu1  ;;  %645 = vmatprep.mubr.f32.mxu1 %v1926_v0  ;;  %v505_v25 = vmax.f32 %v473_v62, 0.0 }
 0x292   :  { %v468_v18 = vadd.f32 %v467_v14, %v304_v3  ;;  %v503_v1 = vmax.f32 %v465_v7, 0.0 }
 0x293   :  { %v506_v38 = vmax.f32 %v476_v12, 0.0 }
 0x294   :  { %646 = vmatmul.mubr.f32.gmra.mrb[24].mxu1 %v499_v44  ;;  %v504_v55 = vmax.f32 %v468_v18, 0.0 }
 0x295   :  { %651 = vmatprep.mubr.f32.mxu1 %v1926_v0 }
 0x296   :  { %v1474_v21 = vpop.f32.mrb[12].mxu1 }
 0x297   :  { %v489_v22 = vadd.f32 %v1474_v21, %v334_v37  ;;  %v480_v8 = vpop.f32.mrb[13].mxu1 }
 0x298   :  { %v481_v28 = vadd.f32 %v480_v8, %v322_v48  ;;  %v1475_v29 = vpop.f32.mrb[14].mxu1  ;;  %652 = vmatmul.mubr.f32.gmra.mrb[26].mxu1 %v500_v19 }
 0x299   :  { %v492_v31 = vadd.f32 %v1475_v29, %v340_v41  ;;  %v483_v32 = vpop.f32.mrb[15].mxu1  ;;  %657 = vmatprep.mubr.f32.mxu1 %v1926_v0  ;;  %v509_v42 = vmax.f32 %v489_v22, 0.0 }
 0x29a   :  { %v484_v36 = vadd.f32 %v483_v32, %v328_v26  ;;  %v507_v39 = vmax.f32 %v481_v28, 0.0 }
 0x29b   :  { %v510_v43 = vmax.f32 %v492_v31, 0.0 }
 0x29c   :  { %658 = vmatmul.mubr.f32.gmra.mrb[28].mxu1 %v501_v58  ;;  %v508_v40 = vmax.f32 %v484_v36, 0.0 }
 0x29d   :  { %663 = vmatprep.mubr.f32.mxu1 %v1926_v0 }
 0x2a0   :  { %664 = vmatmul.mubr.f32.gmra.mrb[30].mxu1 %v502_v51 }
 0x2a1   :  { %669 = vmatprep.mubr.f32.mxu1 %v1926_v0 }
 0x2a4   :  { %670 = vmatmul.mubr.f32.gmra.mrb[32].mxu1 %v503_v1 }
 0x2a5   :  { %675 = vmatprep.mubr.f32.mxu1 %v1926_v0 }
 0x2a8   :  { %676 = vmatmul.mubr.f32.gmra.mrb[34].mxu1 %v504_v55 }
 0x2a9   :  { %681 = vmatprep.mubr.f32.mxu1 %v1926_v0 }
 0x2ac   :  { %682 = vmatmul.mubr.f32.gmra.mrb[36].mxu1 %v505_v25 }
 0x2ad   :  { %687 = vmatprep.mubr.f32.mxu1 %v1926_v0 }
 0x2b0   :  { %688 = vmatmul.mubr.f32.gmra.mrb[38].mxu1 %v506_v38 }
 0x2b1   :  { %693 = vmatprep.mubr.f32.mxu1 %v1926_v0 }
 0x2b4   :  { %694 = vmatmul.mubr.f32.gmra.mrb[40].mxu1 %v507_v39 }
 0x2b5   :  { %699 = vmatprep.mubr.f32.mxu1 %v1926_v0 }
 0x2b8   :  { %700 = vmatmul.mubr.f32.gmra.mrb[42].mxu1 %v508_v40 }
 0x2b9   :  { %705 = vmatprep.mubr.f32.mxu1 %v1926_v0 }
 0x2bc   :  { %706 = vmatmul.mubr.f32.gmra.mrb[44].mxu1 %v509_v42 }
 0x2bd   :  { %711 = vmatprep.mubr.f32.mxu1 %v1926_v0 }
 0x2c0   :  { %712 = vmatmul.mubr.f32.gmra.mrb[46].mxu1 %v510_v43 }
 0x2c1   :  { %1524 = vmatprep.mubr.bf16.mxu1 %v2057_v2 }
 0x357   :  { %v623_v45 = vpop.f32.mrb[16].mxu1 }
 0x358   :  { %v2185_v9 = vpop.f32.mrb[17].mxu1  ;;  %v624_v46 = vadd.f32 %v623_v45, %v2183_v6  ;;  %v841_v45 = vld [vmem:[#allocation7 + $0x208] sm:$0xff] }
 0x35b   :  { %v629_v16 = vpop.f32.mrb[18].mxu1 }
 0x35c   :  { %v630_v20 = vadd.f32 %v629_v16, %v2183_v6  ;;  %v2189_v47 = vpop.f32.mrb[19].mxu1  ;;  %v843_v16 = vld [vmem:[#allocation7 + $0x218] sm:$0xff] }
 0x35e   :  { %v718_v49 = vpack.c.bf16 %v630_v20, %v624_v46 }
 0x35f   :  { %v635_v13 = vpop.f32.mrb[20].mxu1 }
 0x360   :  { %v2191_v50 = vpop.f32.mrb[21].mxu1  ;;  %1476 = vmatprep.subr.bf16.mxu0 %v718_v49  ;;  %v636_v52 = vadd.f32 %v635_v13, %v2183_v6 }
 0x361   :  { %1477 = vmatpush3.bf16.msra.mxu0 %v718_v49 }
 0x363   :  { %v641_v2 = vpop.f32.mrb[22].mxu1 }
 0x364   :  { %v642_v56 = vadd.f32 %v641_v2, %v2183_v6  ;;  %v2195_v57 = vpop.f32.mrb[23].mxu1  ;;  %v1660_v2 = vpack.c.bf16 %v843_v16, %v841_v45  ;;  %v862_v45 = vld [vmem:[#allocation7 + $0x2b0] sm:$0xff]  ;;  %v865_v16 = vld [vmem:[#allocation7 + $0x2c8] sm:$0xff] }
 0x366   :  { %v719_v30 = vpack.c.bf16 %v642_v56, %v636_v52  ;;  %v840_v52 = vld [vmem:[#allocation7 + $0x200] sm:$0xff]  ;;  %v842_v56 = vld [vmem:[#allocation7 + $0x210] sm:$0xff] }
 0x367   :  { %v647_v59 = vpop.f32.mrb[24].mxu1 }
 0x368   :  { %v2197_v23 = vpop.f32.mrb[25].mxu1  ;;  %1478 = vmatprep.subr.bf16.mxu0 %v719_v30  ;;  %v648_v60 = vadd.f32 %v647_v59, %v2183_v6  ;;  %v847_v59 = vld [vmem:[#allocation7 + $0x238] sm:$0xff] }
 0x369   :  { %1479 = vmatpush3.bf16.msra.mxu0 %v719_v30  ;;  %v845_v30 = vld [vmem:[#allocation7 + $0x228] sm:$0xff] }
 0x36b   :  { %v653_v34 = vpop.f32.mrb[26].mxu1 }
 0x36c   :  { %v654_v61 = vadd.f32 %v653_v34, %v2183_v6  ;;  %v2201_v27 = vpop.f32.mrb[27].mxu1  ;;  %v1662_v34 = vpack.c.bf16 %v842_v56, %v840_v52  ;;  %v866_v52 = vld [vmem:[#allocation7 + $0x2d0] sm:$0xff] }
 0x36e   :  { %v720_v62 = vpack.c.bf16 %v654_v61, %v648_v60  ;;  %v1664_v60 = vpack.c.bf16 %v847_v59, %v845_v30  ;;  %v844_v61 = vld [vmem:[#allocation7 + $0x220] sm:$0xff]  ;;  %v869_v30 = vld [vmem:[#allocation7 + $0x2e8] sm:$0xff]  ;;  %v871_v59 = vld [vmem:[#allocation7 + $0x2f8] sm:$0xff] }
 0x36f   :  { %v659_v63 = vpop.f32.mrb[28].mxu1 }
 0x370   :  { %v2203_v3 = vpop.f32.mrb[29].mxu1  ;;  %1480 = vmatprep.subr.bf16.mxu0 %v720_v62  ;;  %v660_v10 = vadd.f32 %v659_v63, %v2183_v6  ;;  %v849_v63 = vld [vmem:[#allocation7 + $0x248] sm:$0xff] }
 0x371   :  { %1481 = vmatpush3.bf16.msra.mxu0 %v720_v62  ;;  %v846_v62 = vld [vmem:[#allocation7 + $0x230] sm:$0xff] }
 0x373   :  { %v665_v7 = vpop.f32.mrb[30].mxu1 }
 0x374   :  { %v666_v12 = vadd.f32 %v665_v7, %v2183_v6  ;;  %v2207_v14 = vpop.f32.mrb[31].mxu1  ;;  %v851_v7 = vld [vmem:[#allocation7 + $0x258] sm:$0xff] }
 0x376   :  { %v721_v44 = vpack.c.bf16 %v666_v12, %v660_v10  ;;  %v1668_v10 = vpack.c.bf16 %v851_v7, %v849_v63  ;;  %v848_v12 = vld [vmem:[#allocation7 + $0x240] sm:$0xff]  ;;  %v554_v63 = vrot.slane %v2179_v4, %v2143_v24 }
 0x377   :  { %v671_v18 = vpop.f32.mrb[32].mxu1 }
 0x378   :  { %v2209_v37 = vpop.f32.mrb[33].mxu1  ;;  %1482 = vmatprep.subr.bf16.mxu0 %v721_v44  ;;  %v672_v19 = vadd.f32 %v671_v18, %v2183_v6  ;;  %v853_v18 = vld [vmem:[#allocation7 + $0x268] sm:$0xff]  ;;  %v638_v7 = vadd.f32 %v2191_v50, %v554_v63  ;;  %v662_v4 = vadd.f32 %v2203_v3, %v554_v63 }
 0x379   :  { %1483 = vmatpush3.bf16.msra.mxu0 %v721_v44  ;;  %v850_v44 = vld [vmem:[#allocation7 + $0x250] sm:$0xff] }
 0x37b   :  { %v677_v48 = vpop.f32.mrb[34].mxu1 }
 0x37c   :  { %v678_v21 = vadd.f32 %v677_v48, %v2183_v6  ;;  %v2213_v41 = vpop.f32.mrb[35].mxu1  ;;  %v855_v48 = vld [vmem:[#allocation7 + $0x278] sm:$0xff] }
 0x37e   :  { %v722_v22 = vpack.c.bf16 %v678_v21, %v672_v19  ;;  %v1670_v19 = vpack.c.bf16 %v850_v44, %v848_v12  ;;  %v1672_v21 = vpack.c.bf16 %v855_v48, %v853_v18  ;;  %v644_v12 = vadd.f32 %v2195_v57, %v554_v63 }
 0x37f   :  { %v683_v8 = vpop.f32.mrb[36].mxu1  ;;  %v632_v48 = vadd.f32 %v2189_v47, %v554_v63  ;;  %v668_v57 = vadd.f32 %v2207_v14, %v554_v63  ;;  %v656_v47 = vadd.f32 %v2201_v27, %v554_v63  ;;  %v674_v14 = vadd.f32 %v2209_v37, %v554_v63 }
 0x380   :  { %v2215_v26 = vpop.f32.mrb[37].mxu1  ;;  %1484 = vmatprep.subr.bf16.mxu0 %v722_v22  ;;  %v684_v29 = vadd.f32 %v683_v8, %v2183_v6  ;;  %v854_v8 = vld [vmem:[#allocation7 + $0x270] sm:$0xff] }
 0x381   :  { %1485 = vmatpush3.bf16.msra.mxu0 %v722_v22  ;;  %v852_v22 = vld [vmem:[#allocation7 + $0x260] sm:$0xff] }
 0x383   :  { %v689_v28 = vpop.f32.mrb[38].mxu1 }
 0x384   :  { %v690_v31 = vadd.f32 %v689_v28, %v2183_v6  ;;  %v2219_v32 = vpop.f32.mrb[39].mxu1  ;;  %v857_v28 = vld [vmem:[#allocation7 + $0x288] sm:$0xff] }
 0x385   :  { %v692_v27 = vadd.f32 %v2219_v32, %v554_v63 }
 0x386   :  { %v723_v58 = vpack.c.bf16 %v690_v31, %v684_v29  ;;  %v859_v29 = vld [vmem:[#allocation7 + $0x298] sm:$0xff]  ;;  %v1674_v31 = vpack.c.bf16 %v854_v8, %v852_v22 }
 0x387   :  { %v695_v36 = vpop.f32.mrb[40].mxu1 }
 0x388   :  { %v2221_v51 = vpop.f32.mrb[41].mxu1  ;;  %1486 = vmatprep.subr.bf16.mxu0 %v723_v58  ;;  %v696_v55 = vadd.f32 %v695_v36, %v2183_v6  ;;  %v856_v36 = vld [vmem:[#allocation7 + $0x280] sm:$0xff] }
 0x389   :  { %1487 = vmatpush3.bf16.msra.mxu0 %v723_v58  ;;  %v1676_v58 = vpack.c.bf16 %v859_v29, %v857_v28  ;;  %v698_v32 = vadd.f32 %v2221_v51, %v554_v63 }
 0x38b   :  { %v701_v1 = vpop.f32.mrb[42].mxu1 }
 0x38c   :  { %v702_v25 = vadd.f32 %v701_v1, %v2183_v6  ;;  %v2225_v38 = vpop.f32.mrb[43].mxu1  ;;  %v858_v1 = vld [vmem:[#allocation7 + $0x290] sm:$0xff] }
 0x38e   :  { %v724_v39 = vpack.c.bf16 %v702_v25, %v696_v55  ;;  %v861_v55 = vld [vmem:[#allocation7 + $0x2a8] sm:$0xff]  ;;  %v863_v25 = vld [vmem:[#allocation7 + $0x2b8] sm:$0xff] }
 0x38f   :  { %v707_v40 = vpop.f32.mrb[44].mxu1 }
 0x390   :  { %v2227_v42 = vpop.f32.mrb[45].mxu1  ;;  %1488 = vmatprep.subr.bf16.mxu0 %v724_v39  ;;  %v708_v46 = vadd.f32 %v707_v40, %v2183_v6  ;;  %v1680_v40 = vpack.c.bf16 %v863_v25, %v861_v55 }
 0x391   :  { %1489 = vmatpush3.bf16.msra.mxu0 %v724_v39  ;;  %v1678_v39 = vpack.c.bf16 %v858_v1, %v856_v36  ;;  %v710_v37 = vadd.f32 %v2227_v42, %v554_v63 }
 0x393   :  { %v713_v43 = vpop.f32.mrb[46].mxu1 }
 0x394   :  { %v714_v20 = vadd.f32 %v713_v43, %v2183_v6  ;;  %v2231_v49 = vpop.f32.mrb[47].mxu1  ;;  %v1666_v6 = vpack.c.bf16 %v846_v62, %v844_v61  ;;  %v860_v43 = vld [vmem:[#allocation7 + $0x2a0] sm:$0xff]  ;;  %v870_v61 = vld [vmem:[#allocation7 + $0x2f0] sm:$0xff] }
 0x396   :  { %v725_v13 = vpack.c.bf16 %v714_v20, %v708_v46  ;;  %v867_v46 = vld [vmem:[#allocation7 + $0x2d8] sm:$0xff]  ;;  %v1682_v20 = vpack.c.bf16 %v862_v45, %v860_v43 }
 0x398   :  { %1490 = vmatprep.subr.bf16.mxu0 %v725_v13 }
 0x399   :  { %1491 = vmatpush3.bf16.msra.mxu0 %v725_v13  ;;  %v1684_v13 = vpack.c.bf16 %v867_v46, %v865_v16 }
 0x39a   :  { %1661 = vmatprep.subr.bf16.mxu0 %v1660_v2  ;;  %v864_v2 = vld [vmem:[#allocation7 + $0x2c0] sm:$0xff] }
 0x39b   :  { %v1686_v56 = vpack.c.bf16 %v866_v52, %v864_v2 }
 0x39c   :  { %1493 = vmatmul.mubr.bf16.vlgmr.msra.gmra.mrb[32].mxu0 %v2120_v15 }
 0x39d   :  { %1496 = vmatprep.mubr.bf16.mxu0 %v2122_v17  ;;  %1663 = vmatpush1.bf16.msra.mxu0 %v1662_v34  ;;  %v1688_v34 = vpack.c.bf16 %v871_v59, %v869_v30 }
 0x39e   :  { %1665 = vmatprep.subr.bf16.mxu0 %v1664_v60  ;;  %v868_v60 = vld [vmem:[#allocation7 + $0x2e0] sm:$0xff] }
 0x39f   :  { %v1690_v62 = vpack.c.bf16 %v870_v61, %v868_v60 }
 0x3a1   :  { %1667 = vmatpush1.bf16.msra.mxu0 %v1666_v6  ;;  %v626_v6 = vadd.f32 %v2185_v9, %v554_v63  ;;  %v650_v9 = vadd.f32 %v2197_v23, %v554_v63  ;;  %v686_v23 = vadd.f32 %v2215_v26, %v554_v63 }
 0x3a2   :  { %1669 = vmatprep.subr.bf16.mxu0 %v1668_v10 }
 0x3a4   :  { %1497 = vmatmul.mubr.bf16.gmra.mrb[36].mxu0 %v2126_v33 }
 0x3a5   :  { %1500 = vmatprep.mubr.bf16.mxu0 %v2128_v35  ;;  %1671 = vmatpush1.bf16.msra.mxu0 %v1670_v19 }
 0x3a6   :  { %1673 = vmatprep.subr.bf16.mxu0 %v1672_v21 }
 0x3a9   :  { %1675 = vmatpush1.bf16.msra.mxu0 %v1674_v31 }
 0x3aa   :  { %1677 = vmatprep.subr.bf16.mxu0 %v1676_v58 }
 0x3ac   :  { %1501 = vmatmul.mubr.bf16.gmra.mrb[40].mxu0 %v2132_v53 }
 0x3ad   :  { %1504 = vmatprep.mubr.bf16.mxu0 %v2134_v54  ;;  %1679 = vmatpush1.bf16.msra.mxu0 %v1678_v39 }
 0x3ae   :  { %1681 = vmatprep.subr.bf16.mxu0 %v1680_v40 }
 0x3b1   :  { %1683 = vmatpush1.bf16.msra.mxu0 %v1682_v20  ;;  %v680_v20 = vadd.f32 %v2213_v41, %v554_v63  ;;  %v716_v41 = vadd.f32 %v2231_v49, %v554_v63 }
 0x3b2   :  { %1685 = vmatprep.subr.bf16.mxu0 %v1684_v13 }
 0x3b4   :  { %1505 = vmatmul.mubr.bf16.gmra.mrb[44].mxu0 %v2138_v11 }
 0x3b5   :  { %1687 = vmatpush1.bf16.msra.mxu0 %v1686_v56  ;;  %949 = vmatprep.mubr.f32.mxu0 %v1926_v0 }
 0x3b6   :  { %1689 = vmatprep.subr.bf16.mxu0 %v1688_v34 }
 0x3b9   :  { %1691 = vmatpush1.bf16.msra.mxu0 %v1690_v62  ;;  %v704_v62 = vadd.f32 %v2225_v38, %v554_v63 }
 0x46f   :  { %v1494_v10 = vpop.f32.mrb[32].mxu0 }
 0x470   :  { %v769_v44 = vadd.f32 %v1494_v10, %v638_v7  ;;  %v760_v18 = vpop.f32.mrb[33].mxu0 }
 0x471   :  { %v761_v19 = vadd.f32 %v760_v18, %v626_v6  ;;  %v1495_v21 = vpop.f32.mrb[34].mxu0 }
 0x472   :  { %v772_v22 = vadd.f32 %v1495_v21, %v644_v12  ;;  %v763_v8 = vpop.f32.mrb[35].mxu0  ;;  %v825_v3 = vmax.f32 %v769_v44, 0.0 }
 0x473   :  { %v823_v28 = vmax.f32 %v761_v19, 0.0  ;;  %v764_v29 = vadd.f32 %v763_v8, %v632_v48  ;;  %v2274_v8 = vld [vmem:[#allocation8 + $0x4] sm:$0x3] }
 0x474   :  { %v826_v43 = vmax.f32 %v772_v22, 0.0 }
 0x475   :  { %950 = vmatmul.mubr.f32.vlgmr.msra.gmra.mrb[48].mxu0 %v823_v28  ;;  %v824_v50 = vmax.f32 %v764_v29, 0.0  ;;  %v2278_v29 = vrot.slane %v2274_v8, %v2064_v5 }
 0x476   :  { %955 = vmatprep.mubr.f32.mxu0 %v1926_v0 }
 0x477   :  { %v1498_v31 = vpop.f32.mrb[36].mxu0 }
 0x478   :  { %v785_v58 = vadd.f32 %v1498_v31, %v662_v4  ;;  %v776_v36 = vpop.f32.mrb[37].mxu0 }
 0x479   :  { %v777_v1 = vadd.f32 %v776_v36, %v650_v9  ;;  %v1499_v55 = vpop.f32.mrb[38].mxu0  ;;  %956 = vmatmul.mubr.f32.gmra.mrb[50].mxu0 %v824_v50 }
 0x47a   :  { %v788_v25 = vadd.f32 %v1499_v55, %v668_v57  ;;  %v779_v39 = vpop.f32.mrb[39].mxu0  ;;  %961 = vmatprep.mubr.f32.mxu0 %v1926_v0  ;;  %v829_v42 = vmax.f32 %v785_v58, 0.0 }
 0x47b   :  { %v780_v40 = vadd.f32 %v779_v39, %v656_v47  ;;  %v827_v26 = vmax.f32 %v777_v1, 0.0 }
 0x47c   :  { %v830_v51 = vmax.f32 %v788_v25, 0.0 }
 0x47d   :  { %962 = vmatmul.mubr.f32.gmra.mrb[52].mxu0 %v825_v3  ;;  %v828_v59 = vmax.f32 %v780_v40, 0.0 }
 0x47e   :  { %967 = vmatprep.mubr.f32.mxu0 %v1926_v0 }
 0x47f   :  { %v1502_v45 = vpop.f32.mrb[40].mxu0 }
 0x480   :  { %v801_v16 = vadd.f32 %v1502_v45, %v686_v23  ;;  %v792_v46 = vpop.f32.mrb[41].mxu0 }
 0x481   :  { %v793_v13 = vadd.f32 %v792_v46, %v674_v14  ;;  %v1503_v2 = vpop.f32.mrb[42].mxu0  ;;  %968 = vmatmul.mubr.f32.gmra.mrb[54].mxu0 %v826_v43 }
 0x482   :  { %v804_v52 = vadd.f32 %v1503_v2, %v692_v27  ;;  %v795_v56 = vpop.f32.mrb[43].mxu0  ;;  %973 = vmatprep.mubr.f32.mxu0 %v1926_v0  ;;  %v833_v63 = vmax.f32 %v801_v16, 0.0 }
 0x483   :  { %v796_v30 = vadd.f32 %v795_v56, %v680_v20  ;;  %v831_v49 = vmax.f32 %v793_v13, 0.0 }
 0x484   :  { %v834_v18 = vmax.f32 %v804_v52, 0.0 }
 0x485   :  { %974 = vmatmul.mubr.f32.gmra.mrb[56].mxu0 %v827_v26  ;;  %v832_v38 = vmax.f32 %v796_v30, 0.0 }
 0x486   :  { %979 = vmatprep.mubr.f32.mxu0 %v1926_v0 }
 0x487   :  { %v1506_v34 = vpop.f32.mrb[44].mxu0 }
 0x488   :  { %v817_v60 = vadd.f32 %v1506_v34, %v710_v37  ;;  %v808_v61 = vpop.f32.mrb[45].mxu0 }
 0x489   :  { %v809_v7 = vadd.f32 %v808_v61, %v698_v32  ;;  %v1507_v6 = vpop.f32.mrb[46].mxu0  ;;  %980 = vmatmul.mubr.f32.gmra.mrb[58].mxu0 %v828_v59 }
 0x48a   :  { %v820_v10 = vadd.f32 %v1507_v6, %v716_v41  ;;  %v811_v12 = vpop.f32.mrb[47].mxu0  ;;  %985 = vmatprep.mubr.f32.mxu0 %v1926_v0  ;;  %v837_v21 = vmax.f32 %v817_v60, 0.0 }
 0x48b   :  { %v812_v44 = vadd.f32 %v811_v12, %v704_v62  ;;  %v835_v48 = vmax.f32 %v809_v7, 0.0 }
 0x48c   :  { %v838_v22 = vmax.f32 %v820_v10, 0.0 }
 0x48d   :  { %986 = vmatmul.mubr.f32.gmra.mrb[60].mxu0 %v829_v42  ;;  %v836_v19 = vmax.f32 %v812_v44, 0.0 }
 0x48e   :  { %991 = vmatprep.mubr.f32.mxu0 %v1926_v0 }
 0x491   :  { %992 = vmatmul.mubr.f32.gmra.mrb[62].mxu0 %v830_v51 }
 0x492   :  { %997 = vmatprep.mubr.f32.mxu0 %v1926_v0 }
 0x495   :  { %998 = vmatmul.mubr.f32.gmra.mrb[64].mxu0 %v831_v49 }
 0x496   :  { %1003 = vmatprep.mubr.f32.mxu0 %v1926_v0 }
 0x499   :  { %1004 = vmatmul.mubr.f32.gmra.mrb[66].mxu0 %v832_v38 }
 0x49a   :  { %1009 = vmatprep.mubr.f32.mxu0 %v1926_v0 }
 0x49d   :  { %1010 = vmatmul.mubr.f32.gmra.mrb[68].mxu0 %v833_v63 }
 0x49e   :  { %1015 = vmatprep.mubr.f32.mxu0 %v1926_v0 }
 0x4a1   :  { %1016 = vmatmul.mubr.f32.gmra.mrb[70].mxu0 %v834_v18 }
 0x4a2   :  { %1021 = vmatprep.mubr.f32.mxu0 %v1926_v0 }
 0x4a5   :  { %1022 = vmatmul.mubr.f32.gmra.mrb[72].mxu0 %v835_v48 }
 0x4a6   :  { %1027 = vmatprep.mubr.f32.mxu0 %v1926_v0 }
 0x4a9   :  { %1028 = vmatmul.mubr.f32.gmra.mrb[74].mxu0 %v836_v19 }
 0x4aa   :  { %1033 = vmatprep.mubr.f32.mxu0 %v1926_v0 }
 0x4ad   :  { %1034 = vmatmul.mubr.f32.gmra.mrb[76].mxu0 %v837_v21  ;;  %v1151_v21 = vld [vmem:[#allocation10] sm:$0xff] }
 0x4ae   :  { %1039 = vmatprep.mubr.f32.mxu0 %v1926_v0 }
 0x4b1   :  { %1040 = vmatmul.mubr.f32.gmra.mrb[78].mxu0 %v838_v22  ;;  %v1152_v22 = vld [vmem:[#allocation10 + $0x8] sm:$0xff] }
 0x548   :  { %v951_v28 = vpop.f32.mrb[48].mxu0 }
 0x549   :  { %v2280_v4 = vpop.f32.mrb[49].mxu0  ;;  %v952_v50 = vadd.f32 %v951_v28, %v2278_v29 }
 0x54c   :  { %v957_v9 = vpop.f32.mrb[50].mxu0 }
 0x54d   :  { %v958_v31 = vadd.f32 %v957_v9, %v2278_v29  ;;  %v2284_v57 = vpop.f32.mrb[51].mxu0 }
 0x54f   :  { %v1046_v58 = vpack.c.bf16 %v958_v31, %v952_v50 }
 0x550   :  { %v963_v0 = vpop.f32.mrb[52].mxu0 }
 0x551   :  { %v2286_v36 = vpop.f32.mrb[53].mxu0  ;;  %1508 = vmatprep.subr.bf16.mxu1 %v1046_v58  ;;  %v964_v1 = vadd.f32 %v963_v0, %v2278_v29  ;;  %v1153_v0 = vld [vmem:[#allocation10 + $0x10] sm:$0xff] }
 0x552   :  { %1509 = vmatpush3.bf16.msra.mxu1 %v1046_v58  ;;  %v1692_v58 = vpack.c.bf16 %v1152_v22, %v1151_v21 }
 0x554   :  { %v969_v47 = vpop.f32.mrb[54].mxu0 }
 0x555   :  { %v970_v5 = vadd.f32 %v969_v47, %v2278_v29  ;;  %v2290_v55 = vpop.f32.mrb[55].mxu0  ;;  %v1154_v47 = vld [vmem:[#allocation10 + $0x18] sm:$0xff] }
 0x557   :  { %v1047_v25 = vpack.c.bf16 %v970_v5, %v964_v1  ;;  %v1696_v1 = vpack.c.bf16 %v1154_v47, %v1153_v0  ;;  %v1155_v5 = vld [vmem:[#allocation10 + $0x20] sm:$0xff] }
 0x558   :  { %v975_v39 = vpop.f32.mrb[56].mxu0 }
 0x559   :  { %v2292_v3 = vpop.f32.mrb[57].mxu0  ;;  %1510 = vmatprep.subr.bf16.mxu1 %v1047_v25  ;;  %v976_v23 = vadd.f32 %v975_v39, %v2278_v29 }
 0x55a   :  { %1511 = vmatpush3.bf16.msra.mxu1 %v1047_v25  ;;  %v1156_v25 = vld [vmem:[#allocation10 + $0x28] sm:$0xff] }
 0x55b   :  { %v1700_v39 = vpack.c.bf16 %v1156_v25, %v1155_v5 }
 0x55c   :  { %v981_v40 = vpop.f32.mrb[58].mxu0 }
 0x55d   :  { %v982_v14 = vadd.f32 %v981_v40, %v2278_v29  ;;  %v2296_v43 = vpop.f32.mrb[59].mxu0  ;;  %v1158_v40 = vld [vmem:[#allocation10 + $0x38] sm:$0xff] }
 0x55f   :  { %v1048_v45 = vpack.c.bf16 %v982_v14, %v976_v23  ;;  %v1159_v14 = vld [vmem:[#allocation10 + $0x40] sm:$0xff] }
 0x560   :  { %v987_v27 = vpop.f32.mrb[60].mxu0 }
 0x561   :  { %v2298_v16 = vpop.f32.mrb[61].mxu0  ;;  %1512 = vmatprep.subr.bf16.mxu1 %v1048_v45  ;;  %v988_v20 = vadd.f32 %v987_v27, %v2278_v29 }
 0x562   :  { %1513 = vmatpush3.bf16.msra.mxu1 %v1048_v45  ;;  %v1160_v45 = vld [vmem:[#allocation10 + $0x48] sm:$0xff] }
 0x563   :  { %v1708_v27 = vpack.c.bf16 %v1160_v45, %v1159_v14 }
 0x564   :  { %v993_v46 = vpop.f32.mrb[62].mxu0 }
 0x565   :  { %v994_v13 = vadd.f32 %v993_v46, %v2278_v29  ;;  %v2302_v2 = vpop.f32.mrb[63].mxu0  ;;  %v1162_v46 = vld [vmem:[#allocation10 + $0x58] sm:$0xff] }
 0x567   :  { %v1049_v52 = vpack.c.bf16 %v994_v13, %v988_v20  ;;  %v1163_v20 = vld [vmem:[#allocation10 + $0x60] sm:$0xff]  ;;  %v1164_v13 = vld [vmem:[#allocation10 + $0x68] sm:$0xff] }
 0x568   :  { %v999_v56 = vpop.f32.mrb[64].mxu0 }
 0x569   :  { %v2304_v26 = vpop.f32.mrb[65].mxu0  ;;  %1514 = vmatprep.subr.bf16.mxu1 %v1049_v52  ;;  %v1000_v37 = vadd.f32 %v999_v56, %v2278_v29 }
 0x56a   :  { %1515 = vmatpush3.bf16.msra.mxu1 %v1049_v52  ;;  %v1716_v52 = vpack.c.bf16 %v1164_v13, %v1163_v20 }
 0x56c   :  { %v1005_v30 = vpop.f32.mrb[66].mxu0 }
 0x56d   :  { %v1006_v32 = vadd.f32 %v1005_v30, %v2278_v29  ;;  %v2308_v59 = vpop.f32.mrb[67].mxu0  ;;  %v882_v30 = vrot.slane %v2274_v8, %v2143_v24 }
 0x56f   :  { %v1050_v34 = vpack.c.bf16 %v1006_v32, %v1000_v37  ;;  %v972_v32 = vadd.f32 %v2290_v55, %v882_v30  ;;  %v990_v24 = vadd.f32 %v2298_v16, %v882_v30  ;;  %v978_v8 = vadd.f32 %v2292_v3, %v882_v30 }
 0x570   :  { %v1011_v41 = vpop.f32.mrb[68].mxu0  ;;  %v1002_v3 = vadd.f32 %v2304_v26, %v882_v30 }
 0x571   :  { %v2310_v60 = vpop.f32.mrb[69].mxu0  ;;  %1516 = vmatprep.subr.bf16.mxu1 %v1050_v34  ;;  %v1012_v62 = vadd.f32 %v1011_v41, %v2278_v29 }
 0x572   :  { %1517 = vmatpush3.bf16.msra.mxu1 %v1050_v34  ;;  %v1014_v16 = vadd.f32 %v2310_v60, %v882_v30 }
 0x574   :  { %v1017_v61 = vpop.f32.mrb[70].mxu0 }
 0x575   :  { %v1018_v7 = vadd.f32 %v1017_v61, %v2278_v29  ;;  %v2314_v6 = vpop.f32.mrb[71].mxu0 }
 0x577   :  { %v1051_v10 = vpack.c.bf16 %v1018_v7, %v1012_v62 }
 0x578   :  { %v1023_v12 = vpop.f32.mrb[72].mxu0 }
 0x579   :  { %v2316_v42 = vpop.f32.mrb[73].mxu0  ;;  %1518 = vmatprep.subr.bf16.mxu1 %v1051_v10  ;;  %v1024_v51 = vadd.f32 %v1023_v12, %v2278_v29 }
 0x57a   :  { %1519 = vmatpush3.bf16.msra.mxu1 %v1051_v10  ;;  %v1026_v26 = vadd.f32 %v2316_v42, %v882_v30 }
 0x57c   :  { %v1029_v44 = vpop.f32.mrb[74].mxu0 }
 0x57d   :  { %v1030_v49 = vadd.f32 %v1029_v44, %v2278_v29  ;;  %v2320_v38 = vpop.f32.mrb[75].mxu0 }
 0x57f   :  { %v1052_v63 = vpack.c.bf16 %v1030_v49, %v1024_v51  ;;  %v984_v51 = vadd.f32 %v2296_v43, %v882_v30  ;;  %v1008_v43 = vadd.f32 %v2308_v59, %v882_v30  ;;  %v1032_v59 = vadd.f32 %v2320_v38, %v882_v30 }
 0x580   :  { %v1035_v18 = vpop.f32.mrb[76].mxu0 }
 0x581   :  { %v2322_v48 = vpop.f32.mrb[77].mxu0  ;;  %1520 = vmatprep.subr.bf16.mxu1 %v1052_v63  ;;  %v1036_v28 = vadd.f32 %v1035_v18, %v2278_v29 }
 0x582   :  { %1521 = vmatpush3.bf16.msra.mxu1 %v1052_v63  ;;  %v1038_v60 = vadd.f32 %v2322_v48, %v882_v30  ;;  %v1363_v48 = vld [vmem:[#allocation11] ss:$0 sm:$0xff] }
 0x584   :  { %v1041_v19 = vpop.f32.mrb[78].mxu0 }
 0x585   :  { %v1042_v9 = vadd.f32 %v1041_v19, %v2278_v29  ;;  %v2326_v50 = vpop.f32.mrb[79].mxu0  ;;  %v1157_v29 = vld [vmem:[#allocation10 + $0x30] sm:$0xff] }
 0x586   :  { %v1704_v23 = vpack.c.bf16 %v1158_v40, %v1157_v29 }
 0x587   :  { %v1053_v31 = vpack.c.bf16 %v1042_v9, %v1036_v28 }
 0x589   :  { %1522 = vmatprep.subr.bf16.mxu1 %v1053_v31 }
 0x58a   :  { %1523 = vmatpush3.bf16.msra.mxu1 %v1053_v31 }
 0x58b   :  { %1693 = vmatprep.subr.bf16.mxu1 %v1692_v58 }
 0x58d   :  { %1525 = vmatmul.mubr.bf16.vlgmr.msra.gmra.mrb[48].mxu1 %v2120_v15  ;;  %v1161_v15 = vld [vmem:[#allocation10 + $0x50] sm:$0xff] }
 0x58e   :  { %1528 = vmatprep.mubr.bf16.mxu1 %v2122_v17  ;;  %1695 = vmatpush3.bf16.msra.mxu1 %v1692_v58  ;;  %v1712_v17 = vpack.c.bf16 %v1162_v46, %v1161_v15 }
 0x58f   :  { %1697 = vmatprep.subr.bf16.mxu1 %v1696_v1 }
 0x592   :  { %1699 = vmatpush3.bf16.msra.mxu1 %v1696_v1 }
 0x593   :  { %1701 = vmatprep.subr.bf16.mxu1 %v1700_v39 }
 0x595   :  { %1529 = vmatmul.mubr.bf16.gmra.mrb[52].mxu1 %v2126_v33  ;;  %v1165_v33 = vld [vmem:[#allocation10 + $0x70] sm:$0xff] }
 0x596   :  { %1532 = vmatprep.mubr.bf16.mxu1 %v2128_v35  ;;  %1703 = vmatpush3.bf16.msra.mxu1 %v1700_v39  ;;  %v1166_v35 = vld [vmem:[#allocation10 + $0x78] sm:$0xff] }
 0x597   :  { %1705 = vmatprep.subr.bf16.mxu1 %v1704_v23  ;;  %v1720_v56 = vpack.c.bf16 %v1166_v35, %v1165_v33 }
 0x59a   :  { %1707 = vmatpush3.bf16.msra.mxu1 %v1704_v23 }
 0x59b   :  { %1709 = vmatprep.subr.bf16.mxu1 %v1708_v27 }
 0x59d   :  { %1533 = vmatmul.mubr.bf16.gmra.mrb[56].mxu1 %v2132_v53  ;;  %v966_v53 = vadd.f32 %v2286_v36, %v882_v30  ;;  %v996_v36 = vadd.f32 %v2302_v2, %v882_v30  ;;  %v1020_v2 = vadd.f32 %v2314_v6, %v882_v30  ;;  %v1044_v6 = vadd.f32 %v2326_v50, %v882_v30 }
 0x59e   :  { %1536 = vmatprep.mubr.bf16.mxu1 %v2134_v54  ;;  %1711 = vmatpush3.bf16.msra.mxu1 %v1708_v27  ;;  %v954_v54 = vadd.f32 %v2280_v4, %v882_v30 }
 0x59f   :  { %1713 = vmatprep.subr.bf16.mxu1 %v1712_v17 }
 0x5a2   :  { %1715 = vmatpush3.bf16.msra.mxu1 %v1712_v17 }
 0x5a3   :  { %1717 = vmatprep.subr.bf16.mxu1 %v1716_v52 }
 0x5a5   :  { %1537 = vmatmul.mubr.bf16.gmra.mrb[60].mxu1 %v2138_v11  ;;  %v960_v11 = vadd.f32 %v2284_v57, %v882_v30 }
 0x5a6   :  { %1719 = vmatpush3.bf16.msra.mxu1 %v1716_v52 }
 0x5a7   :  { %1721 = vmatprep.subr.bf16.mxu1 %v1720_v56 }
 0x5aa   :  { %1723 = vmatpush3.bf16.msra.mxu1 %v1720_v56 }
 0x660   :  { %v1526_v37 = vpop.f32.mrb[48].mxu1 }
 0x661   :  { %v1097_v34 = vadd.f32 %v1526_v37, %v966_v53  ;;  %v1088_v41 = vpop.f32.mrb[49].mxu1 }
 0x662   :  { %v1089_v61 = vadd.f32 %v1088_v41, %v954_v54  ;;  %v1527_v62 = vpop.f32.mrb[50].mxu1 }
 0x663   :  { %v1100_v7 = vadd.f32 %v1527_v62, %v972_v32  ;;  %v1091_v10 = vpop.f32.mrb[51].mxu1 }
 0x664   :  { %v1092_v12 = vadd.f32 %v1091_v10, %v960_v11  ;;  %1572 = vmatprep.mubr.f32.mxu1 %v1089_v61 }
 0x666   :  { %1573 = vmatmul.mubr.f32.vlgmr.msra.gmra.mrb[64].mxu1 %v1092_v12 }
 0x667   :  { %1575 = vmatprep.mubr.f32.mxu1 %v1097_v34 }
 0x668   :  { %v1530_v4 = vpop.f32.mrb[52].mxu1 }
 0x669   :  { %v1113_v55 = vadd.f32 %v1530_v4, %v990_v24  ;;  %v1104_v44 = vpop.f32.mrb[53].mxu1 }
 0x66a   :  { %v1105_v57 = vadd.f32 %v1104_v44, %v978_v8  ;;  %v1531_v49 = vpop.f32.mrb[54].mxu1  ;;  %1576 = vmatmul.mubr.f32.gmra.mrb[66].mxu1 %v1100_v7 }
 0x66b   :  { %v1116_v63 = vadd.f32 %v1531_v49, %v996_v36  ;;  %v1107_v18 = vpop.f32.mrb[55].mxu1 }
 0x66c   :  { %v1108_v19 = vadd.f32 %v1107_v18, %v984_v51  ;;  %1578 = vmatprep.mubr.f32.mxu1 %v1105_v57 }
 0x66e   :  { %1579 = vmatmul.mubr.f32.gmra.mrb[68].mxu1 %v1108_v19 }
 0x66f   :  { %1581 = vmatprep.mubr.f32.mxu1 %v1113_v55 }
 0x670   :  { %v1534_v21 = vpop.f32.mrb[56].mxu1 }
 0x671   :  { %v1129_v22 = vadd.f32 %v1534_v21, %v1014_v16  ;;  %v1120_v28 = vpop.f32.mrb[57].mxu1 }
 0x672   :  { %v1121_v9 = vadd.f32 %v1120_v28, %v1002_v3  ;;  %v1535_v31 = vpop.f32.mrb[58].mxu1  ;;  %1582 = vmatmul.mubr.f32.gmra.mrb[70].mxu1 %v1116_v63 }
 0x673   :  { %v1132_v58 = vadd.f32 %v1535_v31, %v1020_v2  ;;  %v1123_v0 = vpop.f32.mrb[59].mxu1 }
 0x674   :  { %v1124_v47 = vadd.f32 %v1123_v0, %v1008_v43  ;;  %1584 = vmatprep.mubr.f32.mxu1 %v1121_v9 }
 0x676   :  { %1585 = vmatmul.mubr.f32.gmra.mrb[72].mxu1 %v1124_v47 }
 0x677   :  { %1587 = vmatprep.mubr.f32.mxu1 %v1129_v22 }
 0x678   :  { %v1538_v1 = vpop.f32.mrb[60].mxu1 }
 0x679   :  { %v1145_v5 = vadd.f32 %v1538_v1, %v1038_v60  ;;  %v1136_v25 = vpop.f32.mrb[61].mxu1 }
 0x67a   :  { %v1137_v39 = vadd.f32 %v1136_v25, %v1026_v26  ;;  %v1539_v29 = vpop.f32.mrb[62].mxu1  ;;  %1588 = vmatmul.mubr.f32.gmra.mrb[74].mxu1 %v1132_v58 }
 0x67b   :  { %v1148_v40 = vadd.f32 %v1539_v29, %v1044_v6  ;;  %v1139_v23 = vpop.f32.mrb[63].mxu1 }
 0x67c   :  { %v1140_v14 = vadd.f32 %v1139_v23, %v1032_v59  ;;  %1590 = vmatprep.mubr.f32.mxu1 %v1137_v39 }
 0x67e   :  { %1591 = vmatmul.mubr.f32.gmra.mrb[76].mxu1 %v1140_v14 }
 0x67f   :  { %1593 = vmatprep.mubr.f32.mxu1 %v1145_v5 }
 0x682   :  { %1594 = vmatmul.mubr.f32.gmra.mrb[78].mxu1 %v1148_v40 }
 0x739   :  { %v1574_v45 = vpop.f32.mrb[64].mxu1 }
 0x73a   :  { %v1246_v42 = vadd.f32 %v1574_v45, %v1363_v48  ;;  %v1240_v27 = vpop.f32.mrb[65].mxu1 }
 0x73b   :  { %v1241_v15 = vadd.f32 %v1363_v48, %v1240_v27 }
 0x73c   :  { %1320 = vst [vmem:[#allocation13 + $0x8] sm:$0xff] %v1246_v42 }
 0x73d   :  { %1319 = vst [vmem:[#allocation13] sm:$0xff] %v1241_v15  ;;  %v1577_v50 = vpop.f32.mrb[66].mxu1 }
 0x73e   :  { %v1256_v46 = vadd.f32 %v1577_v50, %v1363_v48  ;;  %v1250_v38 = vpop.f32.mrb[67].mxu1 }
 0x73f   :  { %v1251_v17 = vadd.f32 %v1363_v48, %v1250_v38 }
 0x740   :  { %1322 = vst [vmem:[#allocation13 + $0x18] sm:$0xff] %v1256_v46 }
 0x741   :  { %1321 = vst [vmem:[#allocation13 + $0x10] sm:$0xff] %v1251_v17  ;;  %v1580_v20 = vpop.f32.mrb[68].mxu1 }
 0x742   :  { %v1266_v13 = vadd.f32 %v1580_v20, %v1363_v48  ;;  %v1260_v52 = vpop.f32.mrb[69].mxu1 }
 0x743   :  { %v1261_v33 = vadd.f32 %v1363_v48, %v1260_v52 }
 0x744   :  { %1324 = vst [vmem:[#allocation13 + $0x28] sm:$0xff] %v1266_v13 }
 0x745   :  { %1323 = vst [vmem:[#allocation13 + $0x20] sm:$0xff] %v1261_v33  ;;  %v1583_v35 = vpop.f32.mrb[70].mxu1 }
 0x746   :  { %v1276_v56 = vadd.f32 %v1583_v35, %v1363_v48  ;;  %v1270_v30 = vpop.f32.mrb[71].mxu1 }
 0x747   :  { %v1271_v53 = vadd.f32 %v1363_v48, %v1270_v30 }
 0x748   :  { %1326 = vst [vmem:[#allocation13 + $0x38] sm:$0xff] %v1276_v56 }
 0x749   :  { %1325 = vst [vmem:[#allocation13 + $0x30] sm:$0xff] %v1271_v53  ;;  %v1586_v54 = vpop.f32.mrb[72].mxu1 }
 0x74a   :  { %v1286_v37 = vadd.f32 %v1586_v54, %v1363_v48  ;;  %v1280_v32 = vpop.f32.mrb[73].mxu1 }
 0x74b   :  { %v1281_v34 = vadd.f32 %v1363_v48, %v1280_v32 }
 0x74c   :  { %1328 = vst [vmem:[#allocation13 + $0x48] sm:$0xff] %v1286_v37 }
 0x74d   :  { %1327 = vst [vmem:[#allocation13 + $0x40] sm:$0xff] %v1281_v34  ;;  %v1589_v41 = vpop.f32.mrb[74].mxu1 }
 0x74e   :  { %v1296_v11 = vadd.f32 %v1589_v41, %v1363_v48  ;;  %v1290_v61 = vpop.f32.mrb[75].mxu1 }
 0x74f   :  { %v1291_v62 = vadd.f32 %v1363_v48, %v1290_v61 }
 0x750   :  { %1330 = vst [vmem:[#allocation13 + $0x58] sm:$0xff] %v1296_v11 }
 0x751   :  { %1329 = vst [vmem:[#allocation13 + $0x50] sm:$0xff] %v1291_v62  ;;  %v1592_v7 = vpop.f32.mrb[76].mxu1 }
 0x752   :  { %v1306_v10 = vadd.f32 %v1592_v7, %v1363_v48  ;;  %v1300_v12 = vpop.f32.mrb[77].mxu1 }
 0x753   :  { %v1301_v24 = vadd.f32 %v1363_v48, %v1300_v12 }
 0x754   :  { %1332 = vst [vmem:[#allocation13 + $0x68] sm:$0xff] %v1306_v10 }
 0x755   :  { %1331 = vst [vmem:[#allocation13 + $0x60] sm:$0xff] %v1301_v24  ;;  %v1595_v8 = vpop.f32.mrb[78].mxu1 }
 0x756   :  { %v1316_v4 = vadd.f32 %v1595_v8, %v1363_v48  ;;  %v1310_v36 = vpop.f32.mrb[79].mxu1 }
 0x757   :  { %v1311_v55 = vadd.f32 %v1363_v48, %v1310_v36 }
 0x758   :  { %1334 = vst [vmem:[#allocation13 + $0x78] sm:$0xff] %v1316_v4 }
 0x759   :  { %1333 = vst [vmem:[#allocation13 + $0x70] sm:$0xff] %v1311_v55 }
 0x75a   :  { %1891 = shalt.err (!%p1888_p10)
}
 0x75b   :  { %s1892_s27 = scalar_lea.hbm %s2374_s6, 2048 }
 0x75c   :  { %p1893_p11 = scmp.ne.s32.totalorder %s2374_s6, %s1892_s27  ;;  %p1896_p12 = scmp.lt.u32.totalorder %s1892_s27, %s2374_s6 }
 0x75e   :  { %p1898_p13 = pnand %p1896_p12, %p1893_p11 }
 0x760   :  { %1901 = shalt.err (!%p1898_p13)
}
 0x761   :  { %1346 = dma.vmem_to_hbm [thread:$0]  %s1341_s23, 2048, %s2374_s6, [#allocation4], %s1919_s3, %s1919_s3, %s1920_s10  }
 0x762   :  { %1910 = dma.done.wait [#allocation4], 2048  }
 0x763   :  { %1911 = vsyncadd [#allocation4], 4294965248 }
 0x764   :  { %1350 = vsyncpa [#allocation3], 1 }
 0x765   :  { %1351 = vsyncpa [#allocation6], 1 }
 0x766   :  { %1352 = vsyncpa [#allocation9], 1 }
 0x767   :  { %1353 = vsyncpa [#allocation12], 1 }
 0x768   :  { %1354 = vsyncpa [#allocation4], 1 }

</bundles_post_ra>
